<compile_context>
chip_gen: v5e
topology: v5e:2x2
jax: 0.10.0
libtpu: 0.0.40
codegen_flags: <defaults>
</compile_context>

<pallas_src>
import jax
import jax.numpy as jnp
from jax import lax
from jax.experimental import pallas as pl
from jax.experimental.pallas import tpu as pltpu

IN_F = 784
H1, H2, H3 = 512, 256, 128


def _round_up(v, m):
    return ((v + m - 1) // m) * m


def _leaky_relu(x, slope=0.2):
    return jnp.where(x > 0, x, slope * x)


def discriminator_kernel(x_ref,
                         w1_ref, b1_ref,
                         w2_ref, b2_ref,
                         w3_ref, b3_ref,
                         w4t_ref, b4_ref,
                         o_ref):
    """Fused 4-layer MLP. bf16 MXU matmuls w/ f32 accumulation; bf16 bias +
    LeakyReLU; final layer emitted transposed as a lane-dense (1, tile_b) row."""
    x = x_ref[...].astype(jnp.bfloat16)                              # (tb, 784)

    h = jnp.dot(x, w1_ref[...], preferred_element_type=jnp.float32)
    h = _leaky_relu(h.astype(jnp.bfloat16) + b1_ref[...])            # (tb, 512) bf16

    h = jnp.dot(h, w2_ref[...], preferred_element_type=jnp.float32)
    h = _leaky_relu(h.astype(jnp.bfloat16) + b2_ref[...])            # (tb, 256) bf16

    h = jnp.dot(h, w3_ref[...], preferred_element_type=jnp.float32)
    h = _leaky_relu(h.astype(jnp.bfloat16) + b3_ref[...])            # (tb, 128) bf16

    # Layer 4: (1,128) . (tb,128)^T -> (1, tb)  (NT contraction, lane-dense store)
    zT = lax.dot_general(w4t_ref[...], h,
                         dimension_numbers=(((1,), (1,)), ((), ())),
                         preferred_element_type=jnp.float32)          # (1, tb) f32
    o_ref[...] = jax.nn.sigmoid(zT + b4_ref[...])                     # (1, tb) f32


def prepare_params(params):
    """Convert f32 (in,out) weights / (1,out) biases to kernel layout ONCE:
    bf16 weights + bf16 biases for layers 1-3, transposed (1,128) bf16 row and
    f32 (1,1) bias for layer 4."""
    (w1, b1), (w2, b2), (w3, b3), (w4, b4) = params
    return (w1.astype(jnp.bfloat16), b1.astype(jnp.bfloat16),
            w2.astype(jnp.bfloat16), b2.astype(jnp.bfloat16),
            w3.astype(jnp.bfloat16), b3.astype(jnp.bfloat16),
            w4.T.astype(jnp.bfloat16),            # (1, 128)
            b4.astype(jnp.float32))               # (1, 1)


def _choose_tiling(B, max_tile=1024):
    """Adaptive batch tiling. Returns (tile_b, n_tiles)."""
    Br = _round_up(B, 16)
    # >= 2 tiles once the batch is big enough (v7x has 2 TensorCores).
    n_tiles = max(-(-Br // max_tile), 2 if Br >= 256 else 1)
    if n_tiles == 1:
        return Br, 1
    tile_b = _round_up(-(-Br // n_tiles), 128)    # lane-dense (1, tile_b) store
    return tile_b, n_tiles


def discriminator_forward(x, kernel_params, *, max_tile=1024):
    """x: (B, 1, 28, 28) or (B, 784) f32. Returns (B, 1) f32 probabilities."""
    x = x.reshape(-1, IN_F).astype(jnp.float32)
    B = x.shape[0]
    tile_b, n_tiles = _choose_tiling(B, max_tile)
    B_pad = tile_b * n_tiles
    if B_pad != B:
        x = jnp.pad(x, ((0, B_pad - B), (0, 0)))   # pad batch rows only

    w1, b1, w2, b2, w3, b3, w4t, b4 = kernel_params

    def full(arr):
        return pl.BlockSpec(arr.shape, lambda i: (0, 0))

    flops = 2 * B_pad * (IN_F * H1 + H1 * H2 + H2 * H3 + H3 * 1)
    bytes_accessed = (B_pad * IN_F * 4                                  # f32 input
                      + 2 * (w1.size + w2.size + w3.size + w4t.size)    # bf16 weights
                      + 2 * (b1.size + b2.size + b3.size) + 4 * b4.size
                      + 4 * B_pad)                                      # f32 output row

    weight_bytes = (2 * (w1.size + w2.size + w3.size + w4t.size)
                    + 2 * (b1.size + b2.size + b3.size) + 4 * b4.size)
    vmem_limit = (2 * tile_b * IN_F * 4            # double-buffered f32 input tile
                  + 2 * tile_b * 4                 # double-buffered output row
                  + 2 * weight_bytes               # weights (conservatively x2)
                  + tile_b * (H1 + H2 + H3) * 4    # staged intermediates (generous)
                  + (6 << 20))                     # compiler scratch margin
    vmem_limit = int(max(16 << 20, _round_up(vmem_limit, 1 << 20)))

    # TODO(synk): weight/bias specs could use pipeline_mode=pl.Buffered(1) to
    # skip the second buffer for grid-invariant operands; omitted for maximum
    # compatibility (saves ~1.3 MiB VMEM only).
    out = pl.pallas_call(
        discriminator_kernel,
        out_shape=jax.ShapeDtypeStruct((1, B_pad), jnp.float32),
        grid_spec=pltpu.PrefetchScalarGridSpec(
            num_scalar_prefetch=0,
            grid=(n_tiles,),
            in_specs=[
                pl.BlockSpec((tile_b, IN_F), lambda i: (i, 0)),   # x tile (f32)
                full(w1), full(b1),
                full(w2), full(b2),
                full(w3), full(b3),
                full(w4t), full(b4),
            ],
            out_specs=pl.BlockSpec((1, tile_b), lambda i: (0, i)),
        ),
        compiler_params=pltpu.CompilerParams(
            dimension_semantics=("parallel",),
            vmem_limit_bytes=vmem_limit,
        ),
        cost_estimate=pl.CostEstimate(
            flops=flops,
            transcendentals=B_pad,
            bytes_accessed=int(bytes_accessed),
        ),
    )(x, w1, b1, w2, b2, w3, b3, w4t, b4)

    return out[0, :B].reshape(B, 1)


def init_params(key):
    """Deterministic init mirroring nn.Linear's default uniform(-1/sqrt(in), 1/sqrt(in))."""
    dims = [(IN_F, H1), (H1, H2), (H2, H3), (H3, 1)]
    params = []
    for (din, dout) in dims:
        key, kw, kb = jax.random.split(key, 3)
        bound = 1.0 / (din ** 0.5)
        w = jax.random.uniform(kw, (din, dout), jnp.float32, -bound, bound)
        b = jax.random.uniform(kb, (1, dout), jnp.float32, -bound, bound)
        params.append((w, b))
    return params


def reference_forward(x, params):
    """Plain-JAX f32 reference for correctness checking."""
    x = x.reshape(-1, IN_F).astype(jnp.float32)
    (w1, b1), (w2, b2), (w3, b3), (w4, b4) = params
    h = _leaky_relu(x @ w1 + b1)
    h = _leaky_relu(h @ w2 + b2)
    h = _leaky_relu(h @ w3 + b3)
    return jax.nn.sigmoid(h @ w4 + b4)


if __name__ == "__main__":
    key = jax.random.PRNGKey(0)
    kx1, kx2, kp = jax.random.split(key, 3)

    params = init_params(kp)
    kparams = prepare_params(params)            # converted once, reused per call

    # Case 1: tiny MNIST-like batch (single small tile).
    B1 = 8
    x1 = jax.random.normal(kx1, (B1, 1, 28, 28), jnp.float32)
    out1 = jax.block_until_ready(discriminator_forward(x1, kparams))
    ref1 = reference_forward(x1, params)
    assert out1.shape == (B1, 1), f"bad output shape {out1.shape}"
    assert jnp.allclose(out1, ref1, atol=3e-2, rtol=3e-2), "mismatch vs reference (B=8)"
    assert bool(jnp.all((out1 >= 0.0) & (out1 <= 1.0))), "sigmoid output out of range"

    # Case 2: ragged batch exercising padding + the 2-tile (megacore) path.
    B2 = 300
    x2 = jax.random.normal(kx2, (B2, 784), jnp.float32)
    out2 = jax.block_until_ready(discriminator_forward(x2, kparams))
    ref2 = reference_forward(x2, params)
    assert out2.shape == (B2, 1), f"bad output shape {out2.shape}"
    assert jnp.allclose(out2, ref2, atol=3e-2, rtol=3e-2), "mismatch vs reference (B=300)"
    assert bool(jnp.all((out2 >= 0.0) & (out2 <= 1.0))), "sigmoid output out of range"

    print("KERNEL_OK")
</pallas_src>

<mosaic_0001>
module attributes {stable_mosaic.version = 11 : i64} {
  func.func @discriminator_kernel(%arg0: i32, %arg1: memref<16x784xf32, #tpu.memory_space<vmem>>, %arg2: memref<784x512xbf16, #tpu.memory_space<vmem>>, %arg3: memref<1x512xbf16, #tpu.memory_space<vmem>>, %arg4: memref<512x256xbf16, #tpu.memory_space<vmem>>, %arg5: memref<1x256xbf16, #tpu.memory_space<vmem>>, %arg6: memref<256x128xbf16, #tpu.memory_space<vmem>>, %arg7: memref<1x128xbf16, #tpu.memory_space<vmem>>, %arg8: memref<1x128xbf16, #tpu.memory_space<vmem>>, %arg9: memref<1x1xf32, #tpu.memory_space<vmem>>, %arg10: memref<1x16xf32, #tpu.memory_space<vmem>>) attributes {dimension_semantics = [#tpu.dimension_semantics<parallel>], iteration_bounds = array<i64: 1>, scalar_prefetch = 0 : i64, scratch_operands = 0 : i64, tpu.core_type = #tpu.core_type<tc>, window_params = [{transform_indices = @transform_0, window_bounds = array<i64: 16, 784>}, {pipeline_mode = #tpu.pipeline_mode<synchronous>, transform_indices = @transform_1, window_bounds = array<i64: 784, 512>}, {pipeline_mode = #tpu.pipeline_mode<synchronous>, transform_indices = @transform_2, window_bounds = array<i64: 1, 512>}, {pipeline_mode = #tpu.pipeline_mode<synchronous>, transform_indices = @transform_3, window_bounds = array<i64: 512, 256>}, {pipeline_mode = #tpu.pipeline_mode<synchronous>, transform_indices = @transform_4, window_bounds = array<i64: 1, 256>}, {pipeline_mode = #tpu.pipeline_mode<synchronous>, transform_indices = @transform_5, window_bounds = array<i64: 256, 128>}, {pipeline_mode = #tpu.pipeline_mode<synchronous>, transform_indices = @transform_6, window_bounds = array<i64: 1, 128>}, {pipeline_mode = #tpu.pipeline_mode<synchronous>, transform_indices = @transform_7, window_bounds = array<i64: 1, 128>}, {pipeline_mode = #tpu.pipeline_mode<synchronous>, transform_indices = @transform_8, window_bounds = array<i64: 1, 1>}, {transform_indices = @transform_9, window_bounds = array<i64: 1, 16>}]} {
    %c0 = arith.constant 0 : index
    %c0_0 = arith.constant 0 : index
    %0 = vector.load %arg1[%c0, %c0_0] : memref<16x784xf32, #tpu.memory_space<vmem>>, vector<16x784xf32>
    %1 = arith.truncf %0 : vector<16x784xf32> to vector<16x784xbf16>
    %c0_1 = arith.constant 0 : index
    %c0_2 = arith.constant 0 : index
    %2 = vector.load %arg2[%c0_1, %c0_2] : memref<784x512xbf16, #tpu.memory_space<vmem>>, vector<784x512xbf16>
    %cst = arith.constant dense<0.000000e+00> : vector<16x512xf32>
    %3 = tpu.matmul %1, %2, %cst {dimension_numbers = #tpu.dot_dimension_numbers<[1], [0], [0], [1], [0, 0, 1, 1], [], []>} : vector<16x784xbf16>, vector<784x512xbf16>, vector<16x512xf32> -> vector<16x512xf32>
    %4 = arith.truncf %3 : vector<16x512xf32> to vector<16x512xbf16>
    %c0_3 = arith.constant 0 : index
    %c0_4 = arith.constant 0 : index
    %5 = vector.load %arg3[%c0_3, %c0_4] : memref<1x512xbf16, #tpu.memory_space<vmem>>, vector<1x512xbf16>
    %6 = vector.broadcast %5 : vector<1x512xbf16> to vector<16x512xbf16>
    %7 = arith.addf %4, %6 : vector<16x512xbf16>
    %cst_5 = arith.constant 0.000000e+00 : bf16
    %8 = vector.broadcast %cst_5 : bf16 to vector<16x512xbf16>
    %9 = arith.cmpf ogt, %7, %8 : vector<16x512xbf16>
    %cst_6 = arith.constant 2.001950e-01 : bf16
    %10 = vector.broadcast %cst_6 : bf16 to vector<16x512xbf16>
    %11 = arith.mulf %10, %7 : vector<16x512xbf16>
    %12 = arith.select %9, %7, %11 : vector<16x512xi1>, vector<16x512xbf16>
    %c0_7 = arith.constant 0 : index
    %c0_8 = arith.constant 0 : index
    %13 = vector.load %arg4[%c0_7, %c0_8] : memref<512x256xbf16, #tpu.memory_space<vmem>>, vector<512x256xbf16>
    %cst_9 = arith.constant dense<0.000000e+00> : vector<16x256xf32>
    %14 = tpu.matmul %12, %13, %cst_9 {dimension_numbers = #tpu.dot_dimension_numbers<[1], [0], [0], [1], [0, 0, 1, 1], [], []>} : vector<16x512xbf16>, vector<512x256xbf16>, vector<16x256xf32> -> vector<16x256xf32>
    %15 = arith.truncf %14 : vector<16x256xf32> to vector<16x256xbf16>
    %c0_10 = arith.constant 0 : index
    %c0_11 = arith.constant 0 : index
    %16 = vector.load %arg5[%c0_10, %c0_11] : memref<1x256xbf16, #tpu.memory_space<vmem>>, vector<1x256xbf16>
    %17 = vector.broadcast %16 : vector<1x256xbf16> to vector<16x256xbf16>
    %18 = arith.addf %15, %17 : vector<16x256xbf16>
    %cst_12 = arith.constant 0.000000e+00 : bf16
    %19 = vector.broadcast %cst_12 : bf16 to vector<16x256xbf16>
    %20 = arith.cmpf ogt, %18, %19 : vector<16x256xbf16>
    %cst_13 = arith.constant 2.001950e-01 : bf16
    %21 = vector.broadcast %cst_13 : bf16 to vector<16x256xbf16>
    %22 = arith.mulf %21, %18 : vector<16x256xbf16>
    %23 = arith.select %20, %18, %22 : vector<16x256xi1>, vector<16x256xbf16>
    %c0_14 = arith.constant 0 : index
    %c0_15 = arith.constant 0 : index
    %24 = vector.load %arg6[%c0_14, %c0_15] : memref<256x128xbf16, #tpu.memory_space<vmem>>, vector<256x128xbf16>
    %cst_16 = arith.constant dense<0.000000e+00> : vector<16x128xf32>
    %25 = tpu.matmul %23, %24, %cst_16 {dimension_numbers = #tpu.dot_dimension_numbers<[1], [0], [0], [1], [0, 0, 1, 1], [], []>} : vector<16x256xbf16>, vector<256x128xbf16>, vector<16x128xf32> -> vector<16x128xf32>
    %26 = arith.truncf %25 : vector<16x128xf32> to vector<16x128xbf16>
    %c0_17 = arith.constant 0 : index
    %c0_18 = arith.constant 0 : index
    %27 = vector.load %arg7[%c0_17, %c0_18] : memref<1x128xbf16, #tpu.memory_space<vmem>>, vector<1x128xbf16>
    %28 = vector.broadcast %27 : vector<1x128xbf16> to vector<16x128xbf16>
    %29 = arith.addf %26, %28 : vector<16x128xbf16>
    %cst_19 = arith.constant 0.000000e+00 : bf16
    %30 = vector.broadcast %cst_19 : bf16 to vector<16x128xbf16>
    %31 = arith.cmpf ogt, %29, %30 : vector<16x128xbf16>
    %cst_20 = arith.constant 2.001950e-01 : bf16
    %32 = vector.broadcast %cst_20 : bf16 to vector<16x128xbf16>
    %33 = arith.mulf %32, %29 : vector<16x128xbf16>
    %34 = arith.select %31, %29, %33 : vector<16x128xi1>, vector<16x128xbf16>
    %c0_21 = arith.constant 0 : index
    %c0_22 = arith.constant 0 : index
    %35 = vector.load %arg8[%c0_21, %c0_22] : memref<1x128xbf16, #tpu.memory_space<vmem>>, vector<1x128xbf16>
    %cst_23 = arith.constant dense<0.000000e+00> : vector<1x16xf32>
    %36 = tpu.matmul %35, %34, %cst_23 {dimension_numbers = #tpu.dot_dimension_numbers<[1], [1], [0], [0], [0, 0, 1, 0], [], []>} : vector<1x128xbf16>, vector<16x128xbf16>, vector<1x16xf32> -> vector<1x16xf32>
    %c0_24 = arith.constant 0 : index
    %c0_25 = arith.constant 0 : index
    %37 = vector.load %arg9[%c0_24, %c0_25] : memref<1x1xf32, #tpu.memory_space<vmem>>, vector<1x1xf32>
    %38 = vector.broadcast %37 : vector<1x1xf32> to vector<1x16xf32>
    %39 = arith.addf %36, %38 : vector<1x16xf32>
    %40 = arith.negf %39 : vector<1x16xf32>
    %41 = math.exp %40 : vector<1x16xf32>
    %cst_26 = arith.constant 1.000000e+00 : f32
    %42 = vector.broadcast %cst_26 : f32 to vector<1x16xf32>
    %43 = arith.addf %42, %41 : vector<1x16xf32>
    %44 = arith.divf %42, %43 : vector<1x16xf32>
    %c0_27 = arith.constant 0 : index
    %c0_28 = arith.constant 0 : index
    %45 = vector.load %arg10[%c0_27, %c0_28] : memref<1x16xf32, #tpu.memory_space<vmem>>, vector<1x16xf32>
    tpu.vector_store %arg10[%c0_27, %c0_28], %44 {strides = array<i32>} : memref<1x16xf32, #tpu.memory_space<vmem>>, vector<1x16xf32>,
    return
  }
  func.func @transform_0(%arg0: i32) -> (i32, i32) {
    %c0_i32 = arith.constant 0 : i32
    %c0_i32_0 = arith.constant 0 : i32
    return %arg0, %c0_i32 : i32, i32
  }
  func.func @transform_1(%arg0: i32) -> (i32, i32) {
    %c0_i32 = arith.constant 0 : i32
    %c0_i32_0 = arith.constant 0 : i32
    %c0_i32_1 = arith.constant 0 : i32
    return %c0_i32, %c0_i32_0 : i32, i32
  }
  func.func @transform_2(%arg0: i32) -> (i32, i32) {
    %c0_i32 = arith.constant 0 : i32
    %c0_i32_0 = arith.constant 0 : i32
    %c0_i32_1 = arith.constant 0 : i32
    return %c0_i32, %c0_i32_0 : i32, i32
  }
  func.func @transform_3(%arg0: i32) -> (i32, i32) {
    %c0_i32 = arith.constant 0 : i32
    %c0_i32_0 = arith.constant 0 : i32
    %c0_i32_1 = arith.constant 0 : i32
    return %c0_i32, %c0_i32_0 : i32, i32
  }
  func.func @transform_4(%arg0: i32) -> (i32, i32) {
    %c0_i32 = arith.constant 0 : i32
    %c0_i32_0 = arith.constant 0 : i32
    %c0_i32_1 = arith.constant 0 : i32
    return %c0_i32, %c0_i32_0 : i32, i32
  }
  func.func @transform_5(%arg0: i32) -> (i32, i32) {
    %c0_i32 = arith.constant 0 : i32
    %c0_i32_0 = arith.constant 0 : i32
    %c0_i32_1 = arith.constant 0 : i32
    return %c0_i32, %c0_i32_0 : i32, i32
  }
  func.func @transform_6(%arg0: i32) -> (i32, i32) {
    %c0_i32 = arith.constant 0 : i32
    %c0_i32_0 = arith.constant 0 : i32
    %c0_i32_1 = arith.constant 0 : i32
    return %c0_i32, %c0_i32_0 : i32, i32
  }
  func.func @transform_7(%arg0: i32) -> (i32, i32) {
    %c0_i32 = arith.constant 0 : i32
    %c0_i32_0 = arith.constant 0 : i32
    %c0_i32_1 = arith.constant 0 : i32
    return %c0_i32, %c0_i32_0 : i32, i32
  }
  func.func @transform_8(%arg0: i32) -> (i32, i32) {
    %c0_i32 = arith.constant 0 : i32
    %c0_i32_0 = arith.constant 0 : i32
    %c0_i32_1 = arith.constant 0 : i32
    return %c0_i32, %c0_i32_0 : i32, i32
  }
  func.func @transform_9(%arg0: i32) -> (i32, i32) {
    %c0_i32 = arith.constant 0 : i32
    %c0_i32_0 = arith.constant 0 : i32
    return %c0_i32, %arg0 : i32, i32
  }
}

</mosaic_0001>

<bundles_post_ra>
// kernel: tpu_custom_call.1
= control target key start
LH: loop header
LB: loop body
LE: loop exit
PB: predicated region body
PF: predicated region fallthrough
CT: control target
= control target key end

     0   :  { %s4396_s0 = inlined_call_operand.hbm [shape: f32[16,784], index: 0, kind: input, shape index: {}]   ;;  %s4397_s1 = inlined_call_operand.hbm [shape: bf16[784,512], index: 1, kind: input, shape index: {}]   ;;  %s4398_s2 = inlined_call_operand.hbm [shape: bf16[1,512], index: 2, kind: input, shape index: {}]   ;;  %s4399_s3 = inlined_call_operand.hbm [shape: bf16[512,256], index: 3, kind: input, shape index: {}]   ;;  %s4400_s4 = inlined_call_operand.vmem [shape: bf16[1,256], index: 4, kind: input, shape index: {}]   ;;  %s4401_s5 = inlined_call_operand.hbm [shape: bf16[256,128], index: 5, kind: input, shape index: {}]   ;;  %s4402_s6 = inlined_call_operand.vmem [shape: bf16[1,128], index: 6, kind: input, shape index: {}]   ;;  %s4403_s7 = inlined_call_operand.vmem [shape: bf16[1,128], index: 7, kind: input, shape index: {}]   ;;  %s4404_s8 = inlined_call_operand.<no memory space> [shape: f32[1,1], index: 8, kind: input, shape index: {}]   ;;  %s4405_s9 = inlined_call_operand.hbm [shape: f32[1,16], index: 9, kind: output, shape index: {}]  }
   0x1   :  { %v14_v0 = vstv %s4404_s8 }
   0x2   :  { %15 = vst [vmem:[#allocation2] sm:$0x1] %v14_v0 }
   0x3   :  { %16 = vsyncpa [#allocation4], 0 }
   0x4   :  { %17 = vsyncpa [#allocation7], 0 }
   0x5   :  { %18 = vsyncpa [#allocation10], 0  ;;  %s37_s13 = sshll.u32 %s4397_s1, 4  ;;  %s38_s13 = int_to_ptr.hbm [resolvable:$true] %s37_s13 }
   0x6   :  { %19 = vsyncpa [#allocation5], 0  ;;  %s4163_s14 = smov [#allocation6]   ;;  %s61_s18 = sshll.u32 %s4399_s3, 4  ;;  %s62_s18 = int_to_ptr.hbm [resolvable:$true] %s61_s18 }
   0x7   :  { %s39_s15 = sshll.u32 %s4163_s14, 4  ;;  %s4164_s19 = smov 256   ;;  %s40_s15 = int_to_ptr.vmem [resolvable:$true] %s39_s15 }
   0x8   :  { %s4165_s20 = smov 16   ;;  %s4166_s8 = smov [#allocation9]  }
   0x9   :  { %45 = dma.hbm_to_vmem [thread:$0]  %s38_s13, 25088, %s40_s15, [#allocation7], %s4164_s19, %s4164_s19, %s4165_s20  }
   0xa   :  { %s63_s21 = sshll.u32 %s4166_s8, 4  ;;  %s4167_s22 = smov 128   ;;  %s64_s21 = int_to_ptr.vmem [resolvable:$true] %s63_s21 }
   0xb   :  { %s4168_s23 = smov 8   ;;  %s24_s25 = sshll.u32 %s4396_s0, 4  ;;  %s25_s25 = int_to_ptr.hbm [resolvable:$true] %s24_s25 }
   0xc   :  { %69 = dma.hbm_to_vmem [thread:$0]  %s62_s18, 8192, %s64_s21, [#allocation10], %s4167_s22, %s4167_s22, %s4168_s23  }
   0xd   :  { %s4169_s26 = smov [#allocation3]   ;;  %s51_s29 = sshll.u32 %s4398_s2, 4  ;;  %s52_s29 = int_to_ptr.hbm [resolvable:$true] %s51_s29 }
   0xe   :  { %s26_s27 = sshll.u32 %s4169_s26, 4  ;;  %s4170_s30 = smov 896   ;;  %s27_s27 = int_to_ptr.vmem [resolvable:$true] %s26_s27 }
   0xf   :  { %s4171_s10 = smov 56   ;;  %s4172_s11 = smov [#allocation8]  }
  0x10   :  { %32 = dma.hbm_to_vmem [thread:$0]  %s25_s25, 1792, %s27_s27, [#allocation4], %s4170_s30, %s4170_s30, %s4171_s10  }
  0x11   :  { %s53_s12 = sshll.u32 %s4172_s11, 4  ;;  %s76_s15 = sshll.u32 %s4401_s5, 4  ;;  %s54_s12 = int_to_ptr.vmem [resolvable:$true] %s53_s12  ;;  %s77_s15 = int_to_ptr.hbm [resolvable:$true] %s76_s15 }
  0x12   :  { %56 = dma.hbm_to_vmem [thread:$0]  %s52_s29, 64, %s54_s12, [#allocation7]  }
  0x13   :  { %s4173_s0 = smov [#allocation11]   ;;  %s4174_s17 = smov 64  }
  0x14   :  { %s78_s16 = sshll.u32 %s4173_s0, 4  ;;  %s4175_s18 = smov 4   ;;  %s79_s16 = int_to_ptr.vmem [resolvable:$true] %s78_s16 }
  0x15   :  { %84 = dma.hbm_to_vmem [thread:$0]  %s77_s15, 2048, %s79_s16, [#allocation10], %s4174_s17, %s4174_s17, %s4175_s18  }
  0x16   :  { %4155 = dma.done.wait [#allocation4], 1792  }
  0x17   :  { %4156 = vsyncadd [#allocation4], 4294965504 }
  0x18   :  { %4157 = dma.done.wait [#allocation7], 25152  }
  0x19   :  { %4158 = vsyncadd [#allocation7], 4294942144 }
  0x1a   :  { %4159 = dma.done.wait [#allocation10], 10240  }
  0x1b   :  { %4160 = vsyncadd [#allocation10], 4294957056  ;;  %v2720_v1 = vld [vmem:[#allocation6 + $0xe0] sm:$0xf]  ;;  %v3745_v2 = vld [vmem:[#allocation6 + $0xec] sm:$0xf0] }
  0x1c   :  { %v2848_v3 = vld [vmem:[#allocation6 + $0x1e0] sm:$0xf]  ;;  %v2721_v4 = vor.u32 %v3745_v2, %v2720_v1  ;;  %v3777_v5 = vld [vmem:[#allocation6 + $0x1ec] sm:$0xf0]  ;;  %vm1309_vm0 = vcmask 130048   ;;  %s4177_s8 = smov [#allocation12]  }
  0x1d   :  { %v2976_v6 = vld [vmem:[#allocation6 + $0x2e0] sm:$0xf]  ;;  %v3809_v7 = vld [vmem:[#allocation6 + $0x2ec] sm:$0xf0]  ;;  %v2849_v8 = vor.u32 %v3777_v5, %v2848_v3  ;;  %s2594_s23 = sshll.u32 %s4405_s9, 4  ;;  %s2595_s23 = int_to_ptr.hbm [resolvable:$true] %s2594_s23 }
  0x1e   :  { %v2977_v9 = vor.u32 %v3809_v7, %v2976_v6  ;;  %v3104_v10 = vld [vmem:[#allocation6 + $0x3e0] sm:$0xf]  ;;  %v3841_v11 = vld [vmem:[#allocation6 + $0x3ec] sm:$0xf0]  ;;  %1313 = vmatpush.bf16.msra.mxu0 %v2721_v4 }
  0x1f   :  { %v2704_v12 = vld [vmem:[#allocation6 + $0xc0] sm:$0xf]  ;;  %v3105_v13 = vor.u32 %v3841_v11, %v3104_v10  ;;  %v3741_v14 = vld [vmem:[#allocation6 + $0xcc] sm:$0xf0]  ;;  %1327 = vmatpush.bf16.msra.mxu1 %v2849_v8 }
  0x20   :  { %v2832_v15 = vld [vmem:[#allocation6 + $0x1c0] sm:$0xf]  ;;  %v3773_v16 = vld [vmem:[#allocation6 + $0x1cc] sm:$0xf0]  ;;  %1341 = vmatpush.bf16.msra.mxu2 %v2977_v9  ;;  %v2705_v17 = vor.u32 %v3741_v14, %v2704_v12 }
  0x21   :  { %v2833_v18 = vor.u32 %v3773_v16, %v2832_v15  ;;  %v2960_v19 = vld [vmem:[#allocation6 + $0x2c0] sm:$0xf]  ;;  %v3805_v20 = vld [vmem:[#allocation6 + $0x2cc] sm:$0xf0]  ;;  %1355 = vmatpush.bf16.msra.mxu3 %v3105_v13 }
  0x22   :  { %v3088_v21 = vld [vmem:[#allocation6 + $0x3c0] sm:$0xf]  ;;  %v2961_v22 = vor.u32 %v3805_v20, %v2960_v19  ;;  %v3837_v23 = vld [vmem:[#allocation6 + $0x3cc] sm:$0xf0]  ;;  %1314 = vmatpush.bf16.msra.mxu0 %v2705_v17 }
  0x23   :  { %v2688_v24 = vld [vmem:[#allocation6 + $0xa0] sm:$0xf]  ;;  %v3737_v25 = vld [vmem:[#allocation6 + $0xac] sm:$0xf0]  ;;  %v3089_v26 = vor.u32 %v3837_v23, %v3088_v21  ;;  %1328 = vmatpush.bf16.msra.mxu1 %v2833_v18 }
  0x24   :  { %v2816_v27 = vld [vmem:[#allocation6 + $0x1a0] sm:$0xf]  ;;  %v3769_v28 = vld [vmem:[#allocation6 + $0x1ac] sm:$0xf0]  ;;  %v2689_v30 = vor.u32 %v3737_v25, %v2688_v24  ;;  %1342 = vmatpush.bf16.msra.mxu2 %v2961_v22 }
  0x25   :  { %v2944_v29 = vld [vmem:[#allocation6 + $0x2a0] sm:$0xf]  ;;  %v3801_v31 = vld [vmem:[#allocation6 + $0x2ac] sm:$0xf0]  ;;  %v2817_v34 = vor.u32 %v3769_v28, %v2816_v27  ;;  %1356 = vmatpush.bf16.msra.mxu3 %v3089_v26 }
  0x26   :  { %v3072_v32 = vld [vmem:[#allocation6 + $0x3a0] sm:$0xf]  ;;  %v3833_v33 = vld [vmem:[#allocation6 + $0x3ac] sm:$0xf0]  ;;  %v2945_v35 = vor.u32 %v3801_v31, %v2944_v29  ;;  %1315 = vmatpush.bf16.msra.mxu0 %v2689_v30 }
  0x27   :  { %v2672_v36 = vld [vmem:[#allocation6 + $0x80] sm:$0xf]  ;;  %v3733_v37 = vld [vmem:[#allocation6 + $0x8c] sm:$0xf0]  ;;  %v3073_v39 = vor.u32 %v3833_v33, %v3072_v32  ;;  %1329 = vmatpush.bf16.msra.mxu1 %v2817_v34  ;;  %v3743_v33 = vld [vmem:[#allocation6 + $0xe4] sm:$0xf] }
  0x28   :  { %v2800_v38 = vld [vmem:[#allocation6 + $0x180] sm:$0xf]  ;;  %v3765_v40 = vld [vmem:[#allocation6 + $0x18c] sm:$0xf0]  ;;  %v2673_v45 = vor.u32 %v3733_v37, %v2672_v36  ;;  %1343 = vmatpush.bf16.msra.mxu2 %v2945_v35  ;;  %v2722_v34 = vld [vmem:[#allocation6 + $0xf0] sm:$0xf0] }
  0x29   :  { %v2928_v41 = vld [vmem:[#allocation6 + $0x280] sm:$0xf]  ;;  %v3797_v42 = vld [vmem:[#allocation6 + $0x28c] sm:$0xf0]  ;;  %v2801_v46 = vor.u32 %v3765_v40, %v2800_v38  ;;  %1357 = vmatpush.bf16.msra.mxu3 %v3073_v39  ;;  %v121_v37 = vld [vmem:[#allocation3 + $0x48] sm:$0xff] }
  0x2a   :  { %v3056_v43 = vld [vmem:[#allocation6 + $0x380] sm:$0xf]  ;;  %v3829_v44 = vld [vmem:[#allocation6 + $0x38c] sm:$0xf0]  ;;  %v2929_v47 = vor.u32 %v3797_v42, %v2928_v41  ;;  %1316 = vmatpush.bf16.msra.mxu0 %v2673_v45  ;;  %v3775_v42 = vld [vmem:[#allocation6 + $0x1e4] sm:$0xf] }
  0x2b   :  { %v2656_v48 = vld [vmem:[#allocation6 + $0x60] sm:$0xf]  ;;  %v3729_v49 = vld [vmem:[#allocation6 + $0x6c] sm:$0xf0]  ;;  %v3057_v51 = vor.u32 %v3829_v44, %v3056_v43  ;;  %1330 = vmatpush.bf16.msra.mxu1 %v2801_v46  ;;  %v119_v44 = vld [vmem:[#allocation3 + $0x38] sm:$0xff] }
  0x2c   :  { %v2784_v50 = vld [vmem:[#allocation6 + $0x160] sm:$0xf]  ;;  %v3761_v52 = vld [vmem:[#allocation6 + $0x16c] sm:$0xf0]  ;;  %v2657_v57 = vor.u32 %v3729_v49, %v2656_v48  ;;  %1344 = vmatpush.bf16.msra.mxu2 %v2929_v47  ;;  %v2850_v47 = vld [vmem:[#allocation6 + $0x1f0] sm:$0xf0] }
  0x2d   :  { %v2912_v53 = vld [vmem:[#allocation6 + $0x260] sm:$0xf]  ;;  %v3793_v54 = vld [vmem:[#allocation6 + $0x26c] sm:$0xf0]  ;;  %v2785_v58 = vor.u32 %v3761_v52, %v2784_v50  ;;  %1358 = vmatpush.bf16.msra.mxu3 %v3057_v51  ;;  %v115_v48 = vld [vmem:[#allocation3 + $0x18] sm:$0xff]  ;;  %v2725_v51 = vor.u32 %v3743_v33, %v2722_v34 }
  0x2e   :  { %v3040_v55 = vld [vmem:[#allocation6 + $0x360] sm:$0xf]  ;;  %v3825_v56 = vld [vmem:[#allocation6 + $0x36c] sm:$0xf0]  ;;  %v2913_v59 = vor.u32 %v3793_v54, %v2912_v53  ;;  %1317 = vmatpush.bf16.msra.mxu0 %v2657_v57  ;;  %v3739_v57 = vld [vmem:[#allocation6 + $0xc4] sm:$0xf] }
  0x2f   :  { %v2640_v60 = vld [vmem:[#allocation6 + $0x40] sm:$0xf]  ;;  %v3725_v61 = vld [vmem:[#allocation6 + $0x4c] sm:$0xf0]  ;;  %v3041_v63 = vor.u32 %v3825_v56, %v3040_v55  ;;  %1331 = vmatpush.bf16.msra.mxu1 %v2785_v58  ;;  %v2706_v58 = vld [vmem:[#allocation6 + $0xd0] sm:$0xf0] }
  0x30   :  { %v2768_v62 = vld [vmem:[#allocation6 + $0x140] sm:$0xf]  ;;  %v3757_v0 = vld [vmem:[#allocation6 + $0x14c] sm:$0xf0]  ;;  %v2641_v5 = vor.u32 %v3725_v61, %v2640_v60  ;;  %1345 = vmatpush.bf16.msra.mxu2 %v2913_v59 }
  0x31   :  { %v2896_v1 = vld [vmem:[#allocation6 + $0x240] sm:$0xf]  ;;  %v3789_v2 = vld [vmem:[#allocation6 + $0x24c] sm:$0xf0]  ;;  %v2769_v7 = vor.u32 %v3757_v0, %v2768_v62  ;;  %1359 = vmatpush.bf16.msra.mxu3 %v3041_v63  ;;  %v113_v62 = vld [vmem:[#allocation3 + $0x8] sm:$0xff]  ;;  %v2853_v0 = vor.u32 %v3775_v42, %v2850_v47 }
  0x32   :  { %v3024_v3 = vld [vmem:[#allocation6 + $0x340] sm:$0xf]  ;;  %v3821_v4 = vld [vmem:[#allocation6 + $0x34c] sm:$0xf0]  ;;  %v2897_v8 = vor.u32 %v3789_v2, %v2896_v1  ;;  %1318 = vmatpush.bf16.msra.mxu0 %v2641_v5  ;;  %v3771_v2 = vld [vmem:[#allocation6 + $0x1c4] sm:$0xf]  ;;  %v2709_v5 = vor.u32 %v3739_v57, %v2706_v58 }
  0x33   :  { %v2624_v6 = vld [vmem:[#allocation6 + $0x20] sm:$0xf]  ;;  %v3721_v9 = vld [vmem:[#allocation6 + $0x2c] sm:$0xf0]  ;;  %v3025_v12 = vor.u32 %v3821_v4, %v3024_v3  ;;  %1332 = vmatpush.bf16.msra.mxu1 %v2769_v7  ;;  %v2834_v3 = vld [vmem:[#allocation6 + $0x1d0] sm:$0xf0] }
  0x34   :  { %v2752_v10 = vld [vmem:[#allocation6 + $0x120] sm:$0xf]  ;;  %v3753_v11 = vld [vmem:[#allocation6 + $0x12c] sm:$0xf0]  ;;  %v2625_v19 = vor.u32 %v3721_v9, %v2624_v6  ;;  %1346 = vmatpush.bf16.msra.mxu2 %v2897_v8  ;;  %v2786_v42 = vld [vmem:[#allocation6 + $0x170] sm:$0xf0] }
  0x35   :  { %v2880_v13 = vld [vmem:[#allocation6 + $0x220] sm:$0xf]  ;;  %v3785_v14 = vld [vmem:[#allocation6 + $0x22c] sm:$0xf0]  ;;  %v2753_v24 = vor.u32 %v3753_v11, %v2752_v10  ;;  %1360 = vmatpush.bf16.msra.mxu3 %v3025_v12  ;;  %v3735_v11 = vld [vmem:[#allocation6 + $0xa4] sm:$0xf] }
  0x36   :  { %v3008_v15 = vld [vmem:[#allocation6 + $0x320] sm:$0xf]  ;;  %v3817_v16 = vld [vmem:[#allocation6 + $0x32c] sm:$0xf0]  ;;  %v2881_v25 = vor.u32 %v3785_v14, %v2880_v13  ;;  %1319 = vmatpush.bf16.msra.mxu0 %v2625_v19  ;;  %v2690_v12 = vld [vmem:[#allocation6 + $0xb0] sm:$0xf0]  ;;  %v2837_v13 = vor.u32 %v3771_v2, %v2834_v3 }
  0x37   :  { %v2608_v17 = vld [vmem:[#allocation6] sm:$0xf]  ;;  %v3717_v18 = vld [vmem:[#allocation6 + $0xc] sm:$0xf0]  ;;  %v3009_v29 = vor.u32 %v3817_v16, %v3008_v15  ;;  %1333 = vmatpush.bf16.msra.mxu1 %v2753_v24  ;;  %v3767_v15 = vld [vmem:[#allocation6 + $0x1a4] sm:$0xf] }
  0x38   :  { %v2736_v20 = vld [vmem:[#allocation6 + $0x100] sm:$0xf]  ;;  %v3749_v21 = vld [vmem:[#allocation6 + $0x10c] sm:$0xf0]  ;;  %v2609_v36 = vor.u32 %v3717_v18, %v2608_v17  ;;  %1347 = vmatpush.bf16.msra.mxu2 %v2881_v25  ;;  %v2818_v16 = vld [vmem:[#allocation6 + $0x1b0] sm:$0xf0]  ;;  %v2693_v18 = vor.u32 %v3735_v11, %v2690_v12 }
  0x39   :  { %v2864_v22 = vld [vmem:[#allocation6 + $0x200] sm:$0xf]  ;;  %v3781_v23 = vld [vmem:[#allocation6 + $0x20c] sm:$0xf0]  ;;  %v2737_v40 = vor.u32 %v3749_v21, %v2736_v20  ;;  %1361 = vmatpush.bf16.msra.mxu3 %v3009_v29  ;;  %v2674_v24 = vld [vmem:[#allocation6 + $0x90] sm:$0xf0]  ;;  %v2821_v25 = vor.u32 %v3767_v15, %v2818_v16 }
  0x3a   :  { %v2992_v26 = vld [vmem:[#allocation6 + $0x300] sm:$0xf]  ;;  %v3813_v27 = vld [vmem:[#allocation6 + $0x30c] sm:$0xf0]  ;;  %v2865_v41 = vor.u32 %v3781_v23, %v2864_v22  ;;  %1320 = vmatpush.bf16.msra.mxu0 %v2609_v36  ;;  %v3731_v23 = vld [vmem:[#allocation6 + $0x84] sm:$0xf] }
  0x3b   :  { %v3232_v28 = vld [vmem:[#allocation6 + $0x4e0] sm:$0xf]  ;;  %v3873_v30 = vld [vmem:[#allocation6 + $0x4ec] sm:$0xf0]  ;;  %v2993_v45 = vor.u32 %v3813_v27, %v2992_v26  ;;  %1334 = vmatpush.bf16.msra.mxu1 %v2737_v40  ;;  %v3763_v27 = vld [vmem:[#allocation6 + $0x184] sm:$0xf] }
  0x3c   :  { %v3360_v31 = vld [vmem:[#allocation6 + $0x5e0] sm:$0xf]  ;;  %v3905_v32 = vld [vmem:[#allocation6 + $0x5ec] sm:$0xf0]  ;;  %v3233_v46 = vor.u32 %v3873_v30, %v3232_v28  ;;  %1348 = vmatpush.bf16.msra.mxu2 %v2865_v41  ;;  %v2802_v28 = vld [vmem:[#allocation6 + $0x190] sm:$0xf0]  ;;  %v2677_v30 = vor.u32 %v3731_v23, %v2674_v24 }
  0x3d   :  { %v114_v35 = vld [vmem:[#allocation3 + $0x10] sm:$0xff]  ;;  %v3909_v39 = vld [vmem:[#allocation6 + $0x60c] sm:$0xf0]  ;;  %v3361_v50 = vor.u32 %v3905_v32, %v3360_v31  ;;  %1362 = vmatpush.bf16.msra.mxu3 %v2993_v45  ;;  %v2658_v36 = vld [vmem:[#allocation6 + $0x70] sm:$0xf0] }
  0x3e   :  { %v3376_v38 = vld [vmem:[#allocation6 + $0x600] sm:$0xf]  ;;  %v112_v43 = vld [vmem:[#allocation3] sm:$0xff]  ;;  %v4246_v55 = vpack.c.bf16 %v121_v37, %v114_v35  ;;  %1369 = vmatpush.bf16.msrb.mxu0 %v3233_v46  ;;  %v3727_v35 = vld [vmem:[#allocation6 + $0x64] sm:$0xf] }
  0x3f   :  { %v122_v49 = vld [vmem:[#allocation3 + $0x50] sm:$0xff]  ;;  %v3869_v53 = vld [vmem:[#allocation6 + $0x4cc] sm:$0xf0]  ;;  %v4248_v59 = vpack.c.bf16 %v119_v44, %v112_v43  ;;  %v3377_v60 = vor.u32 %v3909_v39, %v3376_v38  ;;  %1383 = vmatpush.bf16.msrb.mxu1 %v3361_v50  ;;  %v125_v38 = vld [vmem:[#allocation3 + $0x68] sm:$0xff]  ;;  %v2805_v39 = vor.u32 %v3763_v27, %v2802_v28  ;;  %v2661_v44 = vor.u32 %v3727_v35, %v2658_v36 }
  0x40   :  { %v3216_v52 = vld [vmem:[#allocation6 + $0x4c0] sm:$0xf]  ;;  %v3901_v56 = vld [vmem:[#allocation6 + $0x5cc] sm:$0xf0]  ;;  %v4250_v61 = vpack.c.bf16 %v122_v49, %v115_v48  ;;  %1349 = vmatmul.bf16.vlgmr.msra.gmra.mxu2 %v4246_v55  ;;  %v3759_v41 = vld [vmem:[#allocation6 + $0x164] sm:$0xf] }
  0x41   :  { %v3344_v54 = vld [vmem:[#allocation6 + $0x5c0] sm:$0xf]  ;;  %v120_v63 = vld [vmem:[#allocation3 + $0x40] sm:$0xff]  ;;  %v3217_v1 = vor.u32 %v3869_v53, %v3216_v52  ;;  %1411 = vmatpush.bf16.msrb.mxu3 %v2725_v51  ;;  %1321 = vmatmul.bf16.vlgmr.msra.gmra.mxu0 %v4248_v59  ;;  %v3723_v49 = vld [vmem:[#allocation6 + $0x44] sm:$0xf]  ;;  %v2789_v52 = vor.u32 %v3759_v41, %v2786_v42 }
  0x42   :  { %v3345_v4 = vor.u32 %v3901_v56, %v3344_v54  ;;  %v3200_v6 = vld [vmem:[#allocation6 + $0x4a0] sm:$0xf]  ;;  %v3865_v7 = vld [vmem:[#allocation6 + $0x4ac] sm:$0xf0]  ;;  %v4254_v9 = vpack.c.bf16 %v120_v63, %v113_v62  ;;  %1404 = vmatpush.bf16.msrb.mxu2 %v3377_v60  ;;  %1363 = vmatmul.bf16.vlgmr.msra.gmra.mxu3 %v4250_v61  ;;  %v2642_v50 = vld [vmem:[#allocation6 + $0x50] sm:$0xf0] }
  0x43   :  { %v3328_v8 = vld [vmem:[#allocation6 + $0x5a0] sm:$0xf]  ;;  %v3897_v10 = vld [vmem:[#allocation6 + $0x5ac] sm:$0xf0]  ;;  %1370 = vmatpush.bf16.msrb.mxu0 %v3217_v1  ;;  %v3201_v14 = vor.u32 %v3865_v7, %v3200_v6  ;;  %v3755_v54 = vld [vmem:[#allocation6 + $0x144] sm:$0xf]  ;;  %v2645_v58 = vor.u32 %v3723_v49, %v2642_v50 }
  0x44   :  { %1384 = vmatpush.bf16.msrb.mxu1 %v3345_v4  ;;  %v3329_v17 = vor.u32 %v3897_v10, %v3328_v8  ;;  %v3184_v19 = vld [vmem:[#allocation6 + $0x480] sm:$0xf]  ;;  %v3861_v20 = vld [vmem:[#allocation6 + $0x48c] sm:$0xf0]  ;;  %v2770_v56 = vld [vmem:[#allocation6 + $0x150] sm:$0xf0] }
  0x45   :  { %1412 = vmatpush.bf16.msrb.mxu3 %v2709_v5  ;;  %v3312_v21 = vld [vmem:[#allocation6 + $0x580] sm:$0xf]  ;;  %1335 = vmatmul.bf16.vlgmr.msra.gmra.mxu1 %v4254_v9  ;;  %v3893_v22 = vld [vmem:[#allocation6 + $0x58c] sm:$0xf0]  ;;  %v3185_v26 = vor.u32 %v3861_v20, %v3184_v19  ;;  %v3719_v1 = vld [vmem:[#allocation6 + $0x24] sm:$0xf]  ;;  %v2773_v5 = vor.u32 %v3755_v54, %v2770_v56 }
  0x46   :  { %1425 = vmatpush.bf16.msra.mxu2 %v2853_v0  ;;  %v3313_v29 = vor.u32 %v3893_v22, %v3312_v21  ;;  %v3168_v31 = vld [vmem:[#allocation6 + $0x460] sm:$0xf]  ;;  %v3857_v32 = vld [vmem:[#allocation6 + $0x46c] sm:$0xf0]  ;;  %v2626_v2 = vld [vmem:[#allocation6 + $0x30] sm:$0xf0] }
  0x47   :  { %1371 = vmatpush.bf16.msrb.mxu0 %v3201_v14  ;;  %v3296_v33 = vld [vmem:[#allocation6 + $0x560] sm:$0xf]  ;;  %v3889_v34 = vld [vmem:[#allocation6 + $0x56c] sm:$0xf0]  ;;  %v3169_v40 = vor.u32 %v3857_v32, %v3168_v31  ;;  %v3751_v3 = vld [vmem:[#allocation6 + $0x124] sm:$0xf]  ;;  %v2629_v12 = vor.u32 %v3719_v1, %v2626_v2 }
  0x48   :  { %1385 = vmatpush.bf16.msrb.mxu1 %v3329_v17  ;;  %v118_v37 = vld [vmem:[#allocation3 + $0x30] sm:$0xff]  ;;  %v3297_v43 = vor.u32 %v3889_v34, %v3296_v33  ;;  %v3853_v46 = vld [vmem:[#allocation6 + $0x44c] sm:$0xf0]  ;;  %v2754_v4 = vld [vmem:[#allocation6 + $0x130] sm:$0xf0] }
  0x49   :  { %1413 = vmatpush.bf16.msrb.mxu3 %v2693_v18  ;;  %v3152_v45 = vld [vmem:[#allocation6 + $0x440] sm:$0xf]  ;;  %v3885_v48 = vld [vmem:[#allocation6 + $0x54c] sm:$0xf0]  ;;  %v4258_v51 = vpack.c.bf16 %v125_v38, %v118_v37  ;;  %v3715_v14 = vld [vmem:[#allocation6 + $0x4] sm:$0xf]  ;;  %v2757_v22 = vor.u32 %v3751_v3, %v2754_v4 }
  0x4a   :  { %1426 = vmatpush.bf16.msra.mxu2 %v2837_v13  ;;  %v3280_v47 = vld [vmem:[#allocation6 + $0x540] sm:$0xf]  ;;  %v3153_v53 = vor.u32 %v3853_v46, %v3152_v45  ;;  %v3849_v62 = vld [vmem:[#allocation6 + $0x42c] sm:$0xf0]  ;;  %v2610_v15 = vld [vmem:[#allocation6 + $0x10] sm:$0xf0] }
  0x4b   :  { %1372 = vmatpush.bf16.msrb.mxu0 %v3185_v26  ;;  %v3281_v57 = vor.u32 %v3885_v48, %v3280_v47  ;;  %v3136_v60 = vld [vmem:[#allocation6 + $0x420] sm:$0xf]  ;;  %v3881_v0 = vld [vmem:[#allocation6 + $0x52c] sm:$0xf0]  ;;  %v3807_v16 = vld [vmem:[#allocation6 + $0x2e4] sm:$0xf]  ;;  %v2613_v28 = vor.u32 %v3715_v14, %v2610_v15 }
  0x4c   :  { %1386 = vmatpush.bf16.msrb.mxu1 %v3313_v29  ;;  %v3264_v63 = vld [vmem:[#allocation6 + $0x520] sm:$0xf]  ;;  %v3137_v6 = vor.u32 %v3849_v62, %v3136_v60  ;;  %v3845_v8 = vld [vmem:[#allocation6 + $0x40c] sm:$0xf0]  ;;  %v2978_v17 = vld [vmem:[#allocation6 + $0x2f0] sm:$0xf0] }
  0x4d   :  { %1414 = vmatpush.bf16.msrb.mxu3 %v2677_v30  ;;  %v3120_v7 = vld [vmem:[#allocation6 + $0x400] sm:$0xf]  ;;  %v3265_v11 = vor.u32 %v3881_v0, %v3264_v63  ;;  %v3877_v13 = vld [vmem:[#allocation6 + $0x50c] sm:$0xf0]  ;;  %v3839_v18 = vld [vmem:[#allocation6 + $0x3e4] sm:$0xf]  ;;  %v2981_v32 = vor.u32 %v3807_v16, %v2978_v17 }
  0x4e   :  { %1427 = vmatpush.bf16.msra.mxu2 %v2821_v25  ;;  %v3248_v10 = vld [vmem:[#allocation6 + $0x500] sm:$0xf]  ;;  %v3106_v19 = vld [vmem:[#allocation6 + $0x3f0] sm:$0xf0]  ;;  %v3871_v20 = vld [vmem:[#allocation6 + $0x4e4] sm:$0xf]  ;;  %v3121_v23 = vor.u32 %v3845_v8, %v3120_v7 }
  0x4f   :  { %1373 = vmatpush.bf16.msrb.mxu0 %v3169_v40  ;;  %v3234_v21 = vld [vmem:[#allocation6 + $0x4f0] sm:$0xf0]  ;;  %v123_v25 = vld [vmem:[#allocation3 + $0x58] sm:$0xff]  ;;  %v3747_v26 = vld [vmem:[#allocation6 + $0x104] sm:$0xf]  ;;  %v3249_v27 = vor.u32 %v3877_v13, %v3248_v10  ;;  %v3109_v33 = vor.u32 %v3839_v18, %v3106_v19 }
  0x50   :  { %1387 = vmatpush.bf16.msrb.mxu1 %v3297_v43  ;;  %3390 = vmatmul.msk.bf16.vlgmr.msrb.gmra.mxu2 %vm1309_vm0, %v4258_v51  ;;  %v116_v24 = vld [vmem:[#allocation3 + $0x20] sm:$0xff]  ;;  %v117_v30 = vld [vmem:[#allocation3 + $0x28] sm:$0xff]  ;;  %v3903_v34 = vld [vmem:[#allocation6 + $0x5e4] sm:$0xf]  ;;  %v3237_v37 = vor.u32 %v3871_v20, %v3234_v21 }
  0x51   :  { %1415 = vmatpush.bf16.msrb.mxu3 %v2661_v44  ;;  %v2738_v29 = vld [vmem:[#allocation6 + $0x110] sm:$0xf0]  ;;  %v3803_v36 = vld [vmem:[#allocation6 + $0x2c4] sm:$0xf]  ;;  %v4262_v38 = vpack.c.bf16 %v123_v25, %v116_v24 }
  0x52   :  { %1428 = vmatpush.bf16.msra.mxu2 %v2805_v39  ;;  %v124_v31 = vld [vmem:[#allocation3 + $0x60] sm:$0xff]  ;;  %v3835_v40 = vld [vmem:[#allocation6 + $0x3c4] sm:$0xf]  ;;  %v2741_v42 = vor.u32 %v3747_v26, %v2738_v29 }
  0x53   :  { %1374 = vmatpush.bf16.msrb.mxu0 %v3153_v53  ;;  %v3362_v35 = vld [vmem:[#allocation6 + $0x5f0] sm:$0xf0]  ;;  %v4264_v43 = vpack.c.bf16 %v124_v31, %v117_v30  ;;  %v3867_v44 = vld [vmem:[#allocation6 + $0x4c4] sm:$0xf] }
  0x54   :  { %1388 = vmatpush.bf16.msrb.mxu1 %v3281_v57  ;;  %v2962_v39 = vld [vmem:[#allocation6 + $0x2d0] sm:$0xf0]  ;;  %v3365_v46 = vor.u32 %v3903_v34, %v3362_v35  ;;  %v3899_v49 = vld [vmem:[#allocation6 + $0x5c4] sm:$0xf] }
  0x55   :  { %1416 = vmatpush.bf16.msrb.mxu3 %v2645_v58  ;;  %v3090_v41 = vld [vmem:[#allocation6 + $0x3d0] sm:$0xf0]  ;;  %v2965_v47 = vor.u32 %v3803_v36, %v2962_v39  ;;  %v3831_v56 = vld [vmem:[#allocation6 + $0x3a4] sm:$0xf] }
  0x56   :  { %1429 = vmatpush.bf16.msra.mxu2 %v2789_v52  ;;  %v3218_v45 = vld [vmem:[#allocation6 + $0x4d0] sm:$0xf0]  ;;  %v3093_v48 = vor.u32 %v3835_v40, %v3090_v41  ;;  %v3799_v52 = vld [vmem:[#allocation6 + $0x2a4] sm:$0xf] }
  0x57   :  { %1375 = vmatpush.bf16.msrb.mxu0 %v3137_v6  ;;  %v3346_v50 = vld [vmem:[#allocation6 + $0x5d0] sm:$0xf0]  ;;  %v3221_v53 = vor.u32 %v3867_v44, %v3218_v45  ;;  %v3863_v58 = vld [vmem:[#allocation6 + $0x4a4] sm:$0xf] }
  0x58   :  { %1389 = vmatpush.bf16.msrb.mxu1 %v3265_v11  ;;  %v2946_v54 = vld [vmem:[#allocation6 + $0x2b0] sm:$0xf0]  ;;  %v3349_v62 = vor.u32 %v3899_v49, %v3346_v50  ;;  %v3895_v1 = vld [vmem:[#allocation6 + $0x5a4] sm:$0xf] }
  0x59   :  { %1417 = vmatpush.bf16.msrb.mxu3 %v2629_v12  ;;  %v3074_v57 = vld [vmem:[#allocation6 + $0x3b0] sm:$0xf0]  ;;  %v2949_v63 = vor.u32 %v3799_v52, %v2946_v54  ;;  %v3795_v3 = vld [vmem:[#allocation6 + $0x284] sm:$0xf] }
  0x5a   :  { %1430 = vmatpush.bf16.msra.mxu2 %v2773_v5  ;;  %v3202_v60 = vld [vmem:[#allocation6 + $0x4b0] sm:$0xf0]  ;;  %v3077_v0 = vor.u32 %v3831_v56, %v3074_v57  ;;  %v3827_v6 = vld [vmem:[#allocation6 + $0x384] sm:$0xf] }
  0x5b   :  { %1376 = vmatpush.bf16.msrb.mxu0 %v3121_v23  ;;  %v3330_v2 = vld [vmem:[#allocation6 + $0x5b0] sm:$0xf0]  ;;  %v3205_v4 = vor.u32 %v3863_v58, %v3202_v60  ;;  %v3859_v8 = vld [vmem:[#allocation6 + $0x484] sm:$0xf] }
  0x5c   :  { %1390 = vmatpush.bf16.msrb.mxu1 %v3249_v27  ;;  %v2930_v5 = vld [vmem:[#allocation6 + $0x290] sm:$0xf0]  ;;  %v3333_v11 = vor.u32 %v3895_v1, %v3330_v2  ;;  %v3891_v14 = vld [vmem:[#allocation6 + $0x584] sm:$0xf]  ;;  %v2728_v1 = vld [vmem:[#allocation6 + $0xe8] sm:$0xf] }
  0x5d   :  { %1418 = vmatpush.bf16.msrb.mxu3 %v2613_v28  ;;  %v3058_v7 = vld [vmem:[#allocation6 + $0x390] sm:$0xf0]  ;;  %v2933_v12 = vor.u32 %v3795_v3, %v2930_v5  ;;  %v3791_v16 = vld [vmem:[#allocation6 + $0x264] sm:$0xf]  ;;  %v3746_v2 = vld [vmem:[#allocation6 + $0xf4] sm:$0xf0] }
  0x5e   :  { %1431 = vmatpush.bf16.msra.mxu2 %v2757_v22  ;;  %1377 = vmatmul.bf16.vlgmr.msrb.gmra.mxu0 %v4262_v38  ;;  %v3186_v10 = vld [vmem:[#allocation6 + $0x490] sm:$0xf0]  ;;  %v3061_v13 = vor.u32 %v3827_v6, %v3058_v7  ;;  %v3823_v19 = vld [vmem:[#allocation6 + $0x364] sm:$0xf]  ;;  %v2856_v3 = vld [vmem:[#allocation6 + $0x1e8] sm:$0xf] }
  0x5f   :  { %1439 = vmatpush.bf16.msra.mxu0 %v2981_v32  ;;  %1391 = vmatmul.bf16.vlgmr.msrb.gmra.mxu1 %v4264_v43  ;;  %v3314_v15 = vld [vmem:[#allocation6 + $0x590] sm:$0xf0]  ;;  %v3189_v17 = vor.u32 %v3859_v8, %v3186_v10  ;;  %v3855_v21 = vld [vmem:[#allocation6 + $0x464] sm:$0xf]  ;;  %v3778_v5 = vld [vmem:[#allocation6 + $0x1f4] sm:$0xf0] }
  0x60   :  { %1453 = vmatpush.bf16.msra.mxu1 %v3109_v33  ;;  %1419 = vmatmul.bf16.vlgmr.msrb.gmra.mxu3 %v4248_v59  ;;  %v2914_v18 = vld [vmem:[#allocation6 + $0x270] sm:$0xf0]  ;;  %v3317_v23 = vor.u32 %v3891_v14, %v3314_v15  ;;  %v3887_v26 = vld [vmem:[#allocation6 + $0x564] sm:$0xf]  ;;  %v2729_v14 = vor.u32 %v3746_v2, %v2728_v1  ;;  %v2984_v15 = vld [vmem:[#allocation6 + $0x2e8] sm:$0xf] }
  0x61   :  { %1467 = vmatpush.bf16.msra.mxu3 %v3237_v37  ;;  %v3042_v20 = vld [vmem:[#allocation6 + $0x370] sm:$0xf0]  ;;  %v2917_v24 = vor.u32 %v3791_v16, %v2914_v18  ;;  %v3787_v28 = vld [vmem:[#allocation6 + $0x244] sm:$0xf]  ;;  %v3810_v16 = vld [vmem:[#allocation6 + $0x2f4] sm:$0xf0]  ;;  %v2857_v18 = vor.u32 %v3778_v5, %v2856_v3 }
  0x62   :  { %1432 = vmatpush.bf16.msra.mxu2 %v2741_v42  ;;  %v3170_v22 = vld [vmem:[#allocation6 + $0x470] sm:$0xf0]  ;;  %v3045_v25 = vor.u32 %v3823_v19, %v3042_v20  ;;  %v3819_v31 = vld [vmem:[#allocation6 + $0x344] sm:$0xf]  ;;  %v3842_v20 = vld [vmem:[#allocation6 + $0x3f4] sm:$0xf0] }
  0x63   :  { %1440 = vmatpush.bf16.msra.mxu0 %v2965_v47  ;;  %v3298_v27 = vld [vmem:[#allocation6 + $0x570] sm:$0xf0]  ;;  %v3173_v29 = vor.u32 %v3855_v21, %v3170_v22  ;;  %v3851_v33 = vld [vmem:[#allocation6 + $0x444] sm:$0xf]  ;;  %v2712_v21 = vld [vmem:[#allocation6 + $0xc8] sm:$0xf] }
  0x64   :  { %1454 = vmatpush.bf16.msra.mxu1 %v3093_v48  ;;  %v2898_v30 = vld [vmem:[#allocation6 + $0x250] sm:$0xf0]  ;;  %v3301_v35 = vor.u32 %v3887_v26, %v3298_v27  ;;  %v3883_v39 = vld [vmem:[#allocation6 + $0x544] sm:$0xf]  ;;  %v3742_v22 = vld [vmem:[#allocation6 + $0xd4] sm:$0xf0]  ;;  %v2985_v26 = vor.u32 %v3810_v16, %v2984_v15 }
  0x65   :  { %1468 = vmatpush.bf16.msra.mxu3 %v3221_v53  ;;  %1433 = vmatmul.bf16.vlgmr.msra.gmra.mxu2 %v4254_v9  ;;  %v3026_v32 = vld [vmem:[#allocation6 + $0x350] sm:$0xf0]  ;;  %v2901_v36 = vor.u32 %v3787_v28, %v2898_v30  ;;  %v3783_v41 = vld [vmem:[#allocation6 + $0x224] sm:$0xf]  ;;  %v2713_v28 = vor.u32 %v3742_v22, %v2712_v21  ;;  %v3806_v30 = vld [vmem:[#allocation6 + $0x2d4] sm:$0xf0] }
  0x66   :  { %1481 = vmatpush.bf16.msrb.mxu2 %v3365_v46  ;;  %v3154_v34 = vld [vmem:[#allocation6 + $0x450] sm:$0xf0]  ;;  %v3029_v37 = vor.u32 %v3819_v31, %v3026_v32  ;;  %v3815_v45 = vld [vmem:[#allocation6 + $0x324] sm:$0xf]  ;;  %v3096_v31 = vld [vmem:[#allocation6 + $0x3c8] sm:$0xf] }
  0x67   :  { %1441 = vmatpush.bf16.msra.mxu0 %v2949_v63  ;;  %v3282_v40 = vld [vmem:[#allocation6 + $0x550] sm:$0xf0]  ;;  %v3157_v42 = vor.u32 %v3851_v33, %v3154_v34  ;;  %v3847_v47 = vld [vmem:[#allocation6 + $0x424] sm:$0xf]  ;;  %v3838_v33 = vld [vmem:[#allocation6 + $0x3d4] sm:$0xf0] }
  0x68   :  { %1455 = vmatpush.bf16.msra.mxu1 %v3077_v0  ;;  %v2882_v44 = vld [vmem:[#allocation6 + $0x230] sm:$0xf0]  ;;  %v3285_v49 = vor.u32 %v3883_v39, %v3282_v40  ;;  %v3879_v50 = vld [vmem:[#allocation6 + $0x524] sm:$0xf]  ;;  %v2696_v34 = vld [vmem:[#allocation6 + $0xa8] sm:$0xf]  ;;  %v3097_v40 = vor.u32 %v3838_v33, %v3096_v31 }
  0x69   :  { %1469 = vmatpush.bf16.msra.mxu3 %v3205_v4  ;;  %v3010_v46 = vld [vmem:[#allocation6 + $0x330] sm:$0xf0]  ;;  %v2885_v53 = vor.u32 %v3783_v41, %v2882_v44  ;;  %v3779_v56 = vld [vmem:[#allocation6 + $0x204] sm:$0xf]  ;;  %v3802_v44 = vld [vmem:[#allocation6 + $0x2b4] sm:$0xf0] }
  0x6a   :  { %1482 = vmatpush.bf16.msrb.mxu2 %v3349_v62  ;;  %v3138_v48 = vld [vmem:[#allocation6 + $0x430] sm:$0xf0]  ;;  %v3013_v54 = vor.u32 %v3815_v45, %v3010_v46  ;;  %v3811_v58 = vld [vmem:[#allocation6 + $0x304] sm:$0xf]  ;;  %v3080_v45 = vld [vmem:[#allocation6 + $0x3a8] sm:$0xf] }
  0x6b   :  { %1442 = vmatpush.bf16.msra.mxu0 %v2933_v12  ;;  %v3266_v52 = vld [vmem:[#allocation6 + $0x530] sm:$0xf0]  ;;  %v3141_v60 = vor.u32 %v3847_v47, %v3138_v48  ;;  %v3843_v63 = vld [vmem:[#allocation6 + $0x404] sm:$0xf]  ;;  %v3834_v47 = vld [vmem:[#allocation6 + $0x3b4] sm:$0xf0] }
  0x6c   :  { %1456 = vmatpush.bf16.msra.mxu1 %v3061_v13  ;;  %v2866_v57 = vld [vmem:[#allocation6 + $0x210] sm:$0xf0]  ;;  %v3269_v4 = vor.u32 %v3879_v50, %v3266_v52  ;;  %v3907_v6 = vld [vmem:[#allocation6 + $0x604] sm:$0xf]  ;;  %v2680_v48 = vld [vmem:[#allocation6 + $0x88] sm:$0xf] }
  0x6d   :  { %1470 = vmatpush.bf16.msra.mxu3 %v3189_v17  ;;  %v2994_v62 = vld [vmem:[#allocation6 + $0x310] sm:$0xf0]  ;;  %v2869_v8 = vor.u32 %v3779_v56, %v2866_v57  ;;  %v3112_v17 = vld [vmem:[#allocation6 + $0x3e8] sm:$0xf]  ;;  %v3766_v52 = vld [vmem:[#allocation6 + $0x194] sm:$0xf0] }
  0x6e   :  { %1483 = vmatpush.bf16.msrb.mxu2 %v3333_v11  ;;  %v3122_v0 = vld [vmem:[#allocation6 + $0x410] sm:$0xf0]  ;;  %v2997_v10 = vor.u32 %v3811_v58, %v2994_v62  ;;  %v3875_v11 = vld [vmem:[#allocation6 + $0x504] sm:$0xf]  ;;  %v3113_v27 = vor.u32 %v3842_v20, %v3112_v17  ;;  %v2808_v50 = vld [vmem:[#allocation6 + $0x188] sm:$0xf] }
  0x6f   :  { %1443 = vmatpush.bf16.msra.mxu0 %v2917_v24  ;;  %v3378_v7 = vld [vmem:[#allocation6 + $0x610] sm:$0xf0]  ;;  %v3125_v13 = vor.u32 %v3843_v63, %v3122_v0  ;;  %v2840_v24 = vld [vmem:[#allocation6 + $0x1c8] sm:$0xf]  ;;  %v3798_v58 = vld [vmem:[#allocation6 + $0x294] sm:$0xf0]  ;;  %v2809_v62 = vor.u32 %v3766_v52, %v2808_v50 }
  0x70   :  { %1457 = vmatpush.bf16.msra.mxu1 %v3045_v25  ;;  %v3250_v12 = vld [vmem:[#allocation6 + $0x510] sm:$0xf0]  ;;  %v3381_v19 = vor.u32 %v3907_v6, %v3378_v7  ;;  %v3774_v25 = vld [vmem:[#allocation6 + $0x1d4] sm:$0xf0]  ;;  %v2936_v57 = vld [vmem:[#allocation6 + $0x288] sm:$0xf] }
  0x71   :  { %1471 = vmatpush.bf16.msra.mxu3 %v3173_v29  ;;  %v2968_v29 = vld [vmem:[#allocation6 + $0x2c8] sm:$0xf]  ;;  %v2841_v32 = vor.u32 %v3774_v25, %v2840_v24  ;;  %v3830_v63 = vld [vmem:[#allocation6 + $0x394] sm:$0xf0] }
  0x72   :  { %1484 = vmatpush.bf16.msrb.mxu2 %v3317_v23  ;;  %v3253_v23 = vor.u32 %v3875_v11, %v3250_v12  ;;  %v2969_v39 = vor.u32 %v3806_v30, %v2968_v29  ;;  %v2664_v0 = vld [vmem:[#allocation6 + $0x68] sm:$0xf]  ;;  %v3730_v1 = vld [vmem:[#allocation6 + $0x74] sm:$0xf0] }
  0x73   :  { %1444 = vmatpush.bf16.msra.mxu0 %v2901_v36  ;;  %v2824_v36 = vld [vmem:[#allocation6 + $0x1a8] sm:$0xf]  ;;  %v3762_v3 = vld [vmem:[#allocation6 + $0x174] sm:$0xf0]  ;;  %v2665_v6 = vor.u32 %v3730_v1, %v2664_v0 }
  0x74   :  { %1458 = vmatpush.bf16.msra.mxu1 %v3029_v37  ;;  %v3770_v37 = vld [vmem:[#allocation6 + $0x1b4] sm:$0xf0]  ;;  %v2792_v2 = vld [vmem:[#allocation6 + $0x168] sm:$0xf] }
  0x75   :  { %1472 = vmatpush.bf16.msra.mxu3 %v3157_v42  ;;  %v2952_v42 = vld [vmem:[#allocation6 + $0x2a8] sm:$0xf]  ;;  %v2825_v46 = vor.u32 %v3770_v37, %v2824_v36  ;;  %v2793_v11 = vor.u32 %v3762_v3, %v2792_v2  ;;  %v3826_v12 = vld [vmem:[#allocation6 + $0x374] sm:$0xf0] }
  0x76   :  { %1485 = vmatpush.bf16.msrb.mxu2 %v3301_v35  ;;  %v3738_v35 = vld [vmem:[#allocation6 + $0xb4] sm:$0xf0]  ;;  %v2920_v7 = vld [vmem:[#allocation6 + $0x268] sm:$0xf] }
  0x77   :  { %1445 = vmatpush.bf16.msra.mxu0 %v2885_v53  ;;  %v2697_v41 = vor.u32 %v3738_v35, %v2696_v34  ;;  %v2953_v53 = vor.u32 %v3802_v44, %v2952_v42  ;;  %v2776_v15 = vld [vmem:[#allocation6 + $0x148] sm:$0xf]  ;;  %v3758_v16 = vld [vmem:[#allocation6 + $0x154] sm:$0xf0] }
  0x78   :  { %1459 = vmatpush.bf16.msra.mxu1 %v3013_v54  ;;  %v3081_v54 = vor.u32 %v3834_v47, %v3080_v45  ;;  %v2904_v20 = vld [vmem:[#allocation6 + $0x248] sm:$0xf]  ;;  %v3790_v21 = vld [vmem:[#allocation6 + $0x254] sm:$0xf0] }
  0x79   :  { %1473 = vmatpush.bf16.msra.mxu3 %v3141_v60  ;;  %v3064_v60 = vld [vmem:[#allocation6 + $0x388] sm:$0xf]  ;;  %v3822_v24 = vld [vmem:[#allocation6 + $0x354] sm:$0xf0]  ;;  %v2905_v29 = vor.u32 %v3790_v21, %v2904_v20 }
  0x7a   :  { %1486 = vmatpush.bf16.msrb.mxu2 %v3285_v49  ;;  %v3734_v49 = vld [vmem:[#allocation6 + $0x94] sm:$0xf0]  ;;  %v3065_v5 = vor.u32 %v3830_v63, %v3064_v60  ;;  %v3032_v22 = vld [vmem:[#allocation6 + $0x348] sm:$0xf]  ;;  %v2730_v60 = vld [vmem:[#allocation6 + $0xf8] sm:$0xf0] }
  0x7b   :  { %1446 = vmatpush.bf16.msra.mxu0 %v2869_v8  ;;  %v2681_v56 = vor.u32 %v3734_v49, %v2680_v48  ;;  %v3794_v8 = vld [vmem:[#allocation6 + $0x274] sm:$0xf0]  ;;  %v2632_v25 = vld [vmem:[#allocation6 + $0x28] sm:$0xf]  ;;  %v3033_v31 = vor.u32 %v3822_v24, %v3032_v22  ;;  %v2842_v24 = vld [vmem:[#allocation6 + $0x1d8] sm:$0xf0] }
  0x7c   :  { %1460 = vmatpush.bf16.msra.mxu1 %v2997_v10  ;;  %v3048_v10 = vld [vmem:[#allocation6 + $0x368] sm:$0xf]  ;;  %v2921_v17 = vor.u32 %v3794_v8, %v2920_v7  ;;  %v3786_v33 = vld [vmem:[#allocation6 + $0x234] sm:$0xf0] }
  0x7d   :  { %1474 = vmatpush.bf16.msra.mxu3 %v3125_v13  ;;  %v2648_v13 = vld [vmem:[#allocation6 + $0x48] sm:$0xf]  ;;  %v3818_v35 = vld [vmem:[#allocation6 + $0x334] sm:$0xf0] }
  0x7e   :  { %1487 = vmatpush.bf16.msrb.mxu2 %v3269_v4  ;;  %1447 = vmatmul.bf16.vlgmr.msra.gmra.mxu0 %v4246_v55  ;;  %v2937_v4 = vor.u32 %v3798_v58, %v2936_v57  ;;  %v2888_v30 = vld [vmem:[#allocation6 + $0x228] sm:$0xf]  ;;  %v3874_v44 = vld [vmem:[#allocation6 + $0x4f4] sm:$0xf0]  ;;  %v3744_v58 = vld [vmem:[#allocation6 + $0xec] sm:$0xf] }
  0x7f   :  { %1502 = vmatpush.bf16.msrb.mxu0 %v3381_v19  ;;  %1461 = vmatmul.bf16.vlgmr.msra.gmra.mxu1 %v4250_v61  ;;  %v3016_v34 = vld [vmem:[#allocation6 + $0x328] sm:$0xf]  ;;  %v2889_v45 = vor.u32 %v3786_v33, %v2888_v30  ;;  %v3906_v47 = vld [vmem:[#allocation6 + $0x5f4] sm:$0xf0]  ;;  %v2733_v7 = vor.u32 %v3744_v58, %v2730_v60 }
  0x80   :  { %1509 = vmatpush.bf16.msrb.mxu1 %v2729_v14  ;;  %1475 = vmatmul.bf16.vlgmr.msra.gmra.mxu3 %v4262_v38  ;;  %v3726_v14 = vld [vmem:[#allocation6 + $0x54] sm:$0xf0]  ;;  %v2616_v37 = vld [vmem:[#allocation6 + $0x8] sm:$0xf]  ;;  %v3017_v48 = vor.u32 %v3818_v35, %v3016_v34  ;;  %v3768_v35 = vld [vmem:[#allocation6 + $0x1ac] sm:$0xf] }
  0x81   :  { %1523 = vmatpush.bf16.msrb.mxu3 %v2857_v18  ;;  %v3049_v18 = vor.u32 %v3826_v12, %v3048_v10  ;;  %v2649_v19 = vor.u32 %v3726_v14, %v2648_v13  ;;  %v3240_v42 = vld [vmem:[#allocation6 + $0x4e8] sm:$0xf]  ;;  %v3782_v52 = vld [vmem:[#allocation6 + $0x214] sm:$0xf0]  ;;  %v3776_v10 = vld [vmem:[#allocation6 + $0x1ec] sm:$0xf] }
  0x82   :  { %1488 = vmatpush.bf16.msrb.mxu2 %v3253_v23  ;;  %v2777_v23 = vor.u32 %v3758_v16, %v2776_v15  ;;  %v2872_v50 = vld [vmem:[#allocation6 + $0x208] sm:$0xf]  ;;  %v3814_v57 = vld [vmem:[#allocation6 + $0x314] sm:$0xf0]  ;;  %v3740_v12 = vld [vmem:[#allocation6 + $0xcc] sm:$0xf] }
  0x83   :  { %1537 = vmatpush.bf16.msra.mxu0 %v2985_v26  ;;  %v3722_v26 = vld [vmem:[#allocation6 + $0x34] sm:$0xf0]  ;;  %v3224_v63 = vld [vmem:[#allocation6 + $0x4c8] sm:$0xf]  ;;  %v2873_v2 = vor.u32 %v3782_v52, %v2872_v50  ;;  %v2714_v15 = vld [vmem:[#allocation6 + $0xd8] sm:$0xf0] }
  0x84   :  { %1510 = vmatpush.bf16.msrb.mxu1 %v2713_v28  ;;  %v3754_v28 = vld [vmem:[#allocation6 + $0x134] sm:$0xf0]  ;;  %v3352_v1 = vld [vmem:[#allocation6 + $0x5c8] sm:$0xf]  ;;  %v2717_v21 = vor.u32 %v3740_v12, %v2714_v15  ;;  %v2810_v50 = vld [vmem:[#allocation6 + $0x198] sm:$0xf0] }
  0x85   :  { %1524 = vmatpush.bf16.msrb.mxu3 %v2841_v32  ;;  %1489 = vmatmul.bf16.vlgmr.msrb.gmra.mxu2 %v4264_v43  ;;  %v2633_v32 = vor.u32 %v3722_v26, %v2632_v25  ;;  %v3870_v0 = vld [vmem:[#allocation6 + $0x4d4] sm:$0xf0]  ;;  %v3208_v16 = vld [vmem:[#allocation6 + $0x4a8] sm:$0xf]  ;;  %v3736_v25 = vld [vmem:[#allocation6 + $0xac] sm:$0xf] }
  0x86   :  { %1551 = vmatpush.bf16.msra.mxu2 %v3113_v27  ;;  %v2760_v27 = vld [vmem:[#allocation6 + $0x128] sm:$0xf]  ;;  %v3902_v3 = vld [vmem:[#allocation6 + $0x5d4] sm:$0xf0]  ;;  %v3225_v8 = vor.u32 %v3870_v0, %v3224_v63  ;;  %v3728_v52 = vld [vmem:[#allocation6 + $0x6c] sm:$0xf] }
  0x87   :  { %1538 = vmatpush.bf16.msra.mxu0 %v2969_v39  ;;  %v2761_v36 = vor.u32 %v3754_v28, %v2760_v27  ;;  %v3718_v39 = vld [vmem:[#allocation6 + $0x14] sm:$0xf0]  ;;  %v3353_v13 = vor.u32 %v3902_v3, %v3352_v1  ;;  %v2698_v27 = vld [vmem:[#allocation6 + $0xb8] sm:$0xf0]  ;;  %v3192_v28 = vld [vmem:[#allocation6 + $0x488] sm:$0xf] }
  0x88   :  { %1511 = vmatpush.bf16.msrb.mxu1 %v2697_v41  ;;  %v3750_v41 = vld [vmem:[#allocation6 + $0x114] sm:$0xf0]  ;;  %v2617_v49 = vor.u32 %v3718_v39, %v2616_v37  ;;  %v3320_v30 = vld [vmem:[#allocation6 + $0x588] sm:$0xf]  ;;  %v2701_v33 = vor.u32 %v3736_v25, %v2698_v27  ;;  %v3732_v37 = vld [vmem:[#allocation6 + $0x8c] sm:$0xf] }
  0x89   :  { %1525 = vmatpush.bf16.msrb.mxu3 %v2825_v46  ;;  %v3368_v46 = vld [vmem:[#allocation6 + $0x5e8] sm:$0xf]  ;;  %v3886_v60 = vld [vmem:[#allocation6 + $0x554] sm:$0xf0]  ;;  %v3760_v1 = vld [vmem:[#allocation6 + $0x16c] sm:$0xf] }
  0x8a   :  { %1552 = vmatpush.bf16.msra.mxu2 %v3097_v40  ;;  %v2744_v40 = vld [vmem:[#allocation6 + $0x108] sm:$0xf]  ;;  %v3724_v3 = vld [vmem:[#allocation6 + $0x4c] sm:$0xf]  ;;  %v2778_v15 = vld [vmem:[#allocation6 + $0x158] sm:$0xf0] }
  0x8b   :  { %1539 = vmatpush.bf16.msra.mxu0 %v2953_v53  ;;  %v3000_v53 = vld [vmem:[#allocation6 + $0x308] sm:$0xf]  ;;  %v3756_v12 = vld [vmem:[#allocation6 + $0x14c] sm:$0xf]  ;;  %v3114_v27 = vld [vmem:[#allocation6 + $0x3f8] sm:$0xf0] }
  0x8c   :  { %1512 = vmatpush.bf16.msrb.mxu1 %v2681_v56  ;;  %v3241_v56 = vor.u32 %v3874_v44, %v3240_v42  ;;  %v3858_v42 = vld [vmem:[#allocation6 + $0x474] sm:$0xf0]  ;;  %v3304_v44 = vld [vmem:[#allocation6 + $0x568] sm:$0xf]  ;;  %v2781_v25 = vor.u32 %v3756_v12, %v2778_v15  ;;  %v3828_v12 = vld [vmem:[#allocation6 + $0x38c] sm:$0xf] }
  0x8d   :  { %1526 = vmatpush.bf16.msrb.mxu3 %v2809_v62  ;;  %v3369_v62 = vor.u32 %v3906_v47, %v3368_v46  ;;  %v3288_v58 = vld [vmem:[#allocation6 + $0x548] sm:$0xf] }
  0x8e   :  { %1553 = vmatpush.bf16.msra.mxu2 %v3081_v54  ;;  %3391 = vmatmul.msk.bf16.vlgmr.msrb.gmra.mxu0 %vm1309_vm0, %v4258_v51  ;;  %v2745_v54 = vor.u32 %v3750_v41, %v2744_v40  ;;  %v2682_v40 = vld [vmem:[#allocation6 + $0x98] sm:$0xf0]  ;;  %v3176_v41 = vld [vmem:[#allocation6 + $0x468] sm:$0xf] }
  0x8f   :  { %1540 = vmatpush.bf16.msra.mxu0 %v2937_v4  ;;  %v3384_v4 = vld [vmem:[#allocation6 + $0x608] sm:$0xf]  ;;  %v2685_v47 = vor.u32 %v3732_v37, %v2682_v40  ;;  %v3804_v40 = vld [vmem:[#allocation6 + $0x2cc] sm:$0xf] }
  0x90   :  { %1513 = vmatpush.bf16.msrb.mxu1 %v2665_v6  ;;  %v3001_v6 = vor.u32 %v3814_v57, %v3000_v53  ;;  %v3854_v57 = vld [vmem:[#allocation6 + $0x454] sm:$0xf0] }
  0x91   :  { %1527 = vmatpush.bf16.msrb.mxu3 %v2793_v11  ;;  %v2858_v11 = vld [vmem:[#allocation6 + $0x1f8] sm:$0xf0] }
  0x92   :  { %1554 = vmatpush.bf16.msra.mxu2 %v3065_v5  ;;  %v3910_v5 = vld [vmem:[#allocation6 + $0x614] sm:$0xf0]  ;;  %v2861_v20 = vor.u32 %v3776_v10, %v2858_v11 }
  0x93   :  { %1541 = vmatpush.bf16.msra.mxu0 %v2921_v17  ;;  %v3385_v14 = vor.u32 %v3910_v5, %v3384_v4  ;;  %v3866_v17 = vld [vmem:[#allocation6 + $0x4b4] sm:$0xf0]  ;;  %v3289_v4 = vor.u32 %v3886_v60, %v3288_v58  ;;  %v2650_v5 = vld [vmem:[#allocation6 + $0x58] sm:$0xf0]  ;;  %v3800_v58 = vld [vmem:[#allocation6 + $0x2ac] sm:$0xf] }
  0x94   :  { %1514 = vmatpush.bf16.msrb.mxu1 %v2649_v19  ;;  %v3898_v19 = vld [vmem:[#allocation6 + $0x5b4] sm:$0xf0]  ;;  %v3209_v22 = vor.u32 %v3866_v17, %v3208_v16  ;;  %v3720_v16 = vld [vmem:[#allocation6 + $0x2c] sm:$0xf]  ;;  %v2634_v17 = vld [vmem:[#allocation6 + $0x38] sm:$0xf0] }
  0x95   :  { %1528 = vmatpush.bf16.msrb.mxu3 %v2777_v23  ;;  %v3772_v23 = vld [vmem:[#allocation6 + $0x1cc] sm:$0xf]  ;;  %v3882_v10 = vld [vmem:[#allocation6 + $0x534] sm:$0xf0]  ;;  %v2954_v60 = vld [vmem:[#allocation6 + $0x2b8] sm:$0xf0] }
  0x96   :  { %1555 = vmatpush.bf16.msra.mxu2 %v3049_v18  ;;  %v3336_v18 = vld [vmem:[#allocation6 + $0x5a8] sm:$0xf] }
  0x97   :  { %1542 = vmatpush.bf16.msra.mxu0 %v2905_v29  ;;  %v3337_v26 = vor.u32 %v3898_v19, %v3336_v18  ;;  %v3862_v29 = vld [vmem:[#allocation6 + $0x494] sm:$0xf0]  ;;  %v3128_v19 = vld [vmem:[#allocation6 + $0x408] sm:$0xf] }
  0x98   :  { %1515 = vmatpush.bf16.msrb.mxu1 %v2633_v32  ;;  %v2845_v32 = vor.u32 %v3772_v23, %v2842_v24  ;;  %v3193_v34 = vor.u32 %v3862_v29, %v3192_v28  ;;  %v3808_v23 = vld [vmem:[#allocation6 + $0x2ec] sm:$0xf]  ;;  %v2986_v24 = vld [vmem:[#allocation6 + $0x2f8] sm:$0xf0]  ;;  %v2637_v28 = vor.u32 %v3720_v16, %v2634_v17 }
  0x99   :  { %1529 = vmatpush.bf16.msrb.mxu3 %v2761_v36  ;;  %v2826_v36 = vld [vmem:[#allocation6 + $0x1b8] sm:$0xf0]  ;;  %v3896_v17 = vld [vmem:[#allocation6 + $0x5ac] sm:$0xf] }
  0x9a   :  { %1556 = vmatpush.bf16.msra.mxu2 %v3033_v31  ;;  %v3894_v31 = vld [vmem:[#allocation6 + $0x594] sm:$0xf0]  ;;  %v2829_v46 = vor.u32 %v3768_v35, %v2826_v36  ;;  %v2618_v35 = vld [vmem:[#allocation6 + $0x18] sm:$0xf0]  ;;  %v3872_v36 = vld [vmem:[#allocation6 + $0x4ec] sm:$0xf] }
  0x9b   :  { %1543 = vmatpush.bf16.msra.mxu0 %v2889_v45  ;;  %v3321_v39 = vor.u32 %v3894_v31, %v3320_v30  ;;  %v3890_v45 = vld [vmem:[#allocation6 + $0x574] sm:$0xf0]  ;;  %v3752_v30 = vld [vmem:[#allocation6 + $0x12c] sm:$0xf]  ;;  %v2762_v31 = vld [vmem:[#allocation6 + $0x138] sm:$0xf0] }
  0x9c   :  { %1516 = vmatpush.bf16.msrb.mxu1 %v2617_v49  ;;  %v3764_v49 = vld [vmem:[#allocation6 + $0x18c] sm:$0xf]  ;;  %v3305_v53 = vor.u32 %v3890_v45, %v3304_v44  ;;  %v3098_v45 = vld [vmem:[#allocation6 + $0x3d8] sm:$0xf0] }
  0x9d   :  { %1530 = vmatpush.bf16.msrb.mxu3 %v2745_v54  ;;  %v2666_v54 = vld [vmem:[#allocation6 + $0x78] sm:$0xf0]  ;;  %v3836_v44 = vld [vmem:[#allocation6 + $0x3cc] sm:$0xf] }
  0x9e   :  { %1557 = vmatpush.bf16.msra.mxu2 %v3017_v48  ;;  %v3177_v48 = vor.u32 %v3858_v42, %v3176_v41  ;;  %v2669_v63 = vor.u32 %v3728_v52, %v2666_v54  ;;  %v2970_v41 = vld [vmem:[#allocation6 + $0x2d8] sm:$0xf0]  ;;  %v2765_v42 = vor.u32 %v3752_v30, %v2762_v31  ;;  %v3904_v52 = vld [vmem:[#allocation6 + $0x5ec] sm:$0xf] }
  0x9f   :  { %1544 = vmatpush.bf16.msra.mxu0 %v2873_v2  ;;  %1517 = vmatmul.bf16.vlgmr.msrb.gmra.mxu1 %v4248_v59  ;;  %v2794_v2 = vld [vmem:[#allocation6 + $0x178] sm:$0xf0]  ;;  %v3868_v54 = vld [vmem:[#allocation6 + $0x4cc] sm:$0xf] }
  0xa0   :  { %1565 = vmatpush.bf16.msra.mxu1 %v3241_v56  ;;  %1531 = vmatmul.bf16.vlgmr.msrb.gmra.mxu3 %v4254_v9  ;;  %v3160_v56 = vld [vmem:[#allocation6 + $0x448] sm:$0xf]  ;;  %v2797_v11 = vor.u32 %v3760_v1, %v2794_v2  ;;  %v3856_v30 = vld [vmem:[#allocation6 + $0x46c] sm:$0xf] }
  0xa1   :  { %1579 = vmatpush.bf16.msra.mxu3 %v3369_v62  ;;  %v2813_v62 = vor.u32 %v3764_v49, %v2810_v50  ;;  %v3161_v0 = vor.u32 %v3854_v57, %v3160_v56  ;;  %v2973_v50 = vor.u32 %v3804_v40, %v2970_v41  ;;  %v3101_v56 = vor.u32 %v3836_v44, %v3098_v45  ;;  %v3226_v57 = vld [vmem:[#allocation6 + $0x4d8] sm:$0xf0]  ;;  %v3888_v40 = vld [vmem:[#allocation6 + $0x56c] sm:$0xf] }
  0xa2   :  { %1558 = vmatpush.bf16.msra.mxu2 %v3001_v6  ;;  %1545 = vmatmul.bf16.vlgmr.msra.gmra.mxu0 %v4246_v55  ;;  %v3144_v6 = vld [vmem:[#allocation6 + $0x428] sm:$0xf]  ;;  %v3229_v2 = vor.u32 %v3868_v54, %v3226_v57  ;;  %v3306_v41 = vld [vmem:[#allocation6 + $0x578] sm:$0xf0]  ;;  %v3848_v57 = vld [vmem:[#allocation6 + $0x42c] sm:$0xf] }
  0xa3   :  { %1600 = vmatpush.bf16.msrb.mxu0 %v3385_v14  ;;  %v3162_v45 = vld [vmem:[#allocation6 + $0x458] sm:$0xf0] }
  0xa4   :  { %1566 = vmatpush.bf16.msra.mxu1 %v3225_v8  ;;  %v3272_v8 = vld [vmem:[#allocation6 + $0x528] sm:$0xf] }
  0xa5   :  { %1580 = vmatpush.bf16.msra.mxu3 %v3353_v13  ;;  %1559 = vmatmul.bf16.vlgmr.msra.gmra.mxu2 %v4250_v61  ;;  %v2653_v13 = vor.u32 %v3724_v3, %v2650_v5  ;;  %v3273_v18 = vor.u32 %v3882_v10, %v3272_v8  ;;  %v2957_v3 = vor.u32 %v3800_v58, %v2954_v60  ;;  %v3354_v5 = vld [vmem:[#allocation6 + $0x5d8] sm:$0xf0]  ;;  %v3796_v10 = vld [vmem:[#allocation6 + $0x28c] sm:$0xf] }
  0xa6   :  { %1607 = vmatpush.bf16.msrb.mxu2 %v2733_v7  ;;  %v3850_v7 = vld [vmem:[#allocation6 + $0x434] sm:$0xf0]  ;;  %v3210_v8 = vld [vmem:[#allocation6 + $0x4b8] sm:$0xf0] }
  0xa7   :  { %1621 = vmatpush.bf16.msra.mxu0 %v2861_v20  ;;  %v3145_v14 = vor.u32 %v3850_v7, %v3144_v6  ;;  %v3846_v20 = vld [vmem:[#allocation6 + $0x414] sm:$0xf0]  ;;  %v3864_v6 = vld [vmem:[#allocation6 + $0x4ac] sm:$0xf]  ;;  %v3146_v58 = vld [vmem:[#allocation6 + $0x438] sm:$0xf0] }
  0xa8   :  { %1567 = vmatpush.bf16.msra.mxu1 %v3209_v22  ;;  %v3878_v22 = vld [vmem:[#allocation6 + $0x514] sm:$0xf0]  ;;  %v3129_v29 = vor.u32 %v3846_v20, %v3128_v19  ;;  %v3213_v15 = vor.u32 %v3864_v6, %v3210_v8  ;;  %v3860_v19 = vld [vmem:[#allocation6 + $0x48c] sm:$0xf]  ;;  %v3149_v6 = vor.u32 %v3848_v57, %v3146_v58  ;;  %v3934_v57 = vld [vmem:[#allocation9 + $0xb4] sm:$0xf0] }
  0xa9   :  { %1581 = vmatpush.bf16.msra.mxu3 %v3337_v26  ;;  %v3840_v26 = vld [vmem:[#allocation6 + $0x3ec] sm:$0xf] }
  0xaa   :  { %1608 = vmatpush.bf16.msrb.mxu2 %v2717_v21  ;;  %v3256_v21 = vld [vmem:[#allocation6 + $0x508] sm:$0xf]  ;;  %v3117_v37 = vor.u32 %v3840_v26, %v3114_v27  ;;  %v3880_v8 = vld [vmem:[#allocation6 + $0x52c] sm:$0xf] }
  0xab   :  { %1622 = vmatpush.bf16.msra.mxu0 %v2845_v32  ;;  %v3257_v32 = vor.u32 %v3878_v22, %v3256_v21  ;;  %v3194_v21 = vld [vmem:[#allocation6 + $0x498] sm:$0xf0]  ;;  %v3792_v22 = vld [vmem:[#allocation6 + $0x26c] sm:$0xf] }
  0xac   :  { %1568 = vmatpush.bf16.msra.mxu1 %v3193_v34  ;;  %v3716_v34 = vld [vmem:[#allocation6 + $0xc] sm:$0xf]  ;;  %v3197_v26 = vor.u32 %v3860_v19, %v3194_v21 }
  0xad   :  { %1582 = vmatpush.bf16.msra.mxu3 %v3321_v39  ;;  %v3242_v39 = vld [vmem:[#allocation6 + $0x4f8] sm:$0xf0] }
  0xae   :  { %1609 = vmatpush.bf16.msrb.mxu2 %v2701_v33  ;;  %v2989_v33 = vor.u32 %v3808_v23, %v2986_v24  ;;  %v3245_v49 = vor.u32 %v3872_v36, %v3242_v39  ;;  %v2922_v23 = vld [vmem:[#allocation6 + $0x278] sm:$0xf0]  ;;  %v3824_v24 = vld [vmem:[#allocation6 + $0x36c] sm:$0xf] }
  0xaf   :  { %1623 = vmatpush.bf16.msra.mxu0 %v2829_v46  ;;  %v2621_v46 = vor.u32 %v3716_v34, %v2618_v35  ;;  %v2925_v27 = vor.u32 %v3792_v22, %v2922_v23  ;;  %v2906_v34 = vld [vmem:[#allocation6 + $0x258] sm:$0xf0]  ;;  %v3820_v35 = vld [vmem:[#allocation6 + $0x34c] sm:$0xf]  ;;  %v3452_v23 = vld [vmem:[#allocation9 + $0x70] sm:$0xf] }
  0xb0   :  { %1569 = vmatpush.bf16.msra.mxu1 %v3177_v48  ;;  %v2746_v48 = vld [vmem:[#allocation6 + $0x118] sm:$0xf0] }
  0xb1   :  { %1583 = vmatpush.bf16.msra.mxu3 %v3305_v53  ;;  %v3370_v53 = vld [vmem:[#allocation6 + $0x5f8] sm:$0xf0] }
  0xb2   :  { %1610 = vmatpush.bf16.msrb.mxu2 %v2685_v47  ;;  %3392 = vmatmul.msk.bf16.vlgmr.msrb.gmra.mxu0 %vm1309_vm0, %v4258_v51  ;;  %v3748_v47 = vld [vmem:[#allocation6 + $0x10c] sm:$0xf]  ;;  %v3373_v1 = vor.u32 %v3904_v52, %v3370_v53  ;;  %v3034_v36 = vld [vmem:[#allocation6 + $0x358] sm:$0xf0] }
  0xb3   :  { %1624 = vmatpush.bf16.msra.mxu0 %v2813_v62  ;;  %v2749_v62 = vor.u32 %v3748_v47, %v2746_v48  ;;  %v3037_v44 = vor.u32 %v3820_v35, %v3034_v36  ;;  %v2890_v47 = vld [vmem:[#allocation6 + $0x238] sm:$0xf0]  ;;  %v3816_v48 = vld [vmem:[#allocation6 + $0x32c] sm:$0xf] }
  0xb4   :  { %1570 = vmatpush.bf16.msra.mxu1 %v3161_v0  ;;  %v3082_v0 = vld [vmem:[#allocation6 + $0x3b8] sm:$0xf0]  ;;  %v3884_v52 = vld [vmem:[#allocation6 + $0x54c] sm:$0xf] }
  0xb5   :  { %1584 = vmatpush.bf16.msra.mxu3 %v3289_v4  ;;  %v3900_v4 = vld [vmem:[#allocation6 + $0x5cc] sm:$0xf]  ;;  %v3922_v35 = vld [vmem:[#allocation9 + $0x54] sm:$0xf0] }
  0xb6   :  { %1611 = vmatpush.bf16.msrb.mxu2 %v2669_v63  ;;  %v3832_v63 = vld [vmem:[#allocation6 + $0x3ac] sm:$0xf] }
  0xb7   :  { %1625 = vmatpush.bf16.msra.mxu0 %v2797_v11  ;;  %v3085_v7 = vor.u32 %v3832_v63, %v3082_v0  ;;  %v2938_v11 = vld [vmem:[#allocation6 + $0x298] sm:$0xf0]  ;;  %v3812_v0 = vld [vmem:[#allocation6 + $0x30c] sm:$0xf] }
  0xb8   :  { %1571 = vmatpush.bf16.msra.mxu1 %v3145_v14  ;;  %v3357_v14 = vor.u32 %v3900_v4, %v3354_v5  ;;  %v2941_v16 = vor.u32 %v3796_v10, %v2938_v11  ;;  %v2874_v63 = vld [vmem:[#allocation6 + $0x218] sm:$0xf0] }
  0xb9   :  { %1585 = vmatpush.bf16.msra.mxu3 %v3273_v18  ;;  %v3338_v18 = vld [vmem:[#allocation6 + $0x5b8] sm:$0xf0] }
  0xba   :  { %1612 = vmatpush.bf16.msrb.mxu2 %v2653_v13  ;;  %v3066_v13 = vld [vmem:[#allocation6 + $0x398] sm:$0xf0] }
  0xbb   :  { %1626 = vmatpush.bf16.msra.mxu0 %v2781_v25  ;;  %v3069_v20 = vor.u32 %v3828_v12, %v3066_v13  ;;  %v3050_v25 = vld [vmem:[#allocation6 + $0x378] sm:$0xf0]  ;;  %v3844_v12 = vld [vmem:[#allocation6 + $0x40c] sm:$0xf] }
  0xbc   :  { %1572 = vmatpush.bf16.msra.mxu1 %v3129_v29  ;;  %v3322_v29 = vld [vmem:[#allocation6 + $0x598] sm:$0xf0]  ;;  %v3053_v31 = vor.u32 %v3824_v24, %v3050_v25  ;;  %v3516_v25 = vld [vmem:[#allocation9 + $0xf0] sm:$0xf] }
  0xbd   :  { %1586 = vmatpush.bf16.msra.mxu3 %v3257_v32  ;;  %v3178_v32 = vld [vmem:[#allocation6 + $0x478] sm:$0xf0] }
  0xbe   :  { %1613 = vmatpush.bf16.msrb.mxu2 %v2637_v28  ;;  %v3892_v28 = vld [vmem:[#allocation6 + $0x58c] sm:$0xf]  ;;  %v3274_v10 = vld [vmem:[#allocation6 + $0x538] sm:$0xf0] }
  0xbf   :  { %1627 = vmatpush.bf16.msra.mxu0 %v2765_v42  ;;  %1573 = vmatmul.bf16.vlgmr.msra.gmra.mxu1 %v4262_v38  ;;  %v3852_v42 = vld [vmem:[#allocation6 + $0x44c] sm:$0xf]  ;;  %v3130_v13 = vld [vmem:[#allocation6 + $0x418] sm:$0xf0] }
  0xc0   :  { %1635 = vmatpush.bf16.msrb.mxu1 %v2989_v33  ;;  %1587 = vmatmul.bf16.vlgmr.msra.gmra.mxu3 %v4264_v43  ;;  %v3788_v33 = vld [vmem:[#allocation6 + $0x24c] sm:$0xf]  ;;  %v3165_v53 = vor.u32 %v3852_v42, %v3162_v45  ;;  %v3926_v24 = vld [vmem:[#allocation9 + $0x74] sm:$0xf0]  ;;  %v3428_v42 = vld [vmem:[#allocation9 + $0x40] sm:$0xf] }
  0xc1   :  { %1649 = vmatpush.bf16.msrb.mxu3 %v3117_v37  ;;  %v3181_v37 = vor.u32 %v3856_v30, %v3178_v32  ;;  %v2909_v39 = vor.u32 %v3788_v33, %v2906_v34  ;;  %v3436_v34 = vld [vmem:[#allocation9 + $0x50] sm:$0xf]  ;;  %v3492_v45 = vld [vmem:[#allocation9 + $0xc0] sm:$0xf] }
  0xc2   :  { %1614 = vmatpush.bf16.msrb.mxu2 %v2621_v46  ;;  %v3784_v46 = vld [vmem:[#allocation6 + $0x22c] sm:$0xf]  ;;  %v4295_v22 = vpop.f32.mrf.mxu1 }
  0xc3   :  { %1628 = vmatpush.bf16.msra.mxu0 %v2749_v62  ;;  %v2893_v54 = vor.u32 %v3784_v46, %v2890_v47  ;;  %v3780_v62 = vld [vmem:[#allocation6 + $0x20c] sm:$0xf]  ;;  %v4286_v4 = vpop.f32.mrf.mxu2 }
  0xc4   :  { %1636 = vmatpush.bf16.msrb.mxu1 %v2973_v50  ;;  %v3309_v50 = vor.u32 %v3888_v40, %v3306_v41  ;;  %v3936_v47 = vld [vmem:[#allocation9 + $0xc4] sm:$0xf0] }
  0xc5   :  { %1650 = vmatpush.bf16.msrb.mxu3 %v3101_v56  ;;  %1615 = vmatmul.bf16.vlgmr.msrb.gmra.mxu2 %v4248_v59  ;;  %v3341_v59 = vor.u32 %v3896_v17, %v3338_v18  ;;  %v3290_v56 = vld [vmem:[#allocation6 + $0x558] sm:$0xf0]  ;;  %v3876_v17 = vld [vmem:[#allocation6 + $0x50c] sm:$0xf] }
  0xc6   :  { %1663 = vmatpush.bf16.msra.mxu2 %v3245_v49  ;;  %1629 = vmatmul.bf16.vlgmr.msra.gmra.mxu0 %v4254_v9  ;;  %v3325_v9 = vor.u32 %v3892_v28, %v3322_v29  ;;  %v3018_v49 = vld [vmem:[#allocation6 + $0x338] sm:$0xf0]  ;;  %v3293_v5 = vor.u32 %v3884_v52, %v3290_v56  ;;  %v3444_v28 = vld [vmem:[#allocation9 + $0x60] sm:$0xf]  ;;  %v3924_v29 = vld [vmem:[#allocation9 + $0x64] sm:$0xf0] }
  0xc7   :  { %1677 = vmatpush.bf16.msrb.mxu0 %v3373_v1  ;;  %v3021_v60 = vor.u32 %v3816_v48, %v3018_v49  ;;  %v3002_v1 = vld [vmem:[#allocation6 + $0x318] sm:$0xf0]  ;;  %v3445_v30 = vor.u32 %v3924_v29, %v3444_v28  ;;  %v3420_v52 = vld [vmem:[#allocation9 + $0x30] sm:$0xf]  ;;  %v3941_v28 = vld [vmem:[#allocation9 + $0xf4] sm:$0xf] }
  0xc8   :  { %1637 = vmatpush.bf16.msrb.mxu1 %v2957_v3  ;;  %v3386_v3 = vld [vmem:[#allocation6 + $0x618] sm:$0xf0]  ;;  %v3005_v11 = vor.u32 %v3812_v0, %v3002_v1  ;;  %v3476_v1 = vld [vmem:[#allocation9 + $0xa0] sm:$0xf]  ;;  %v3518_v29 = vld [vmem:[#allocation9 + $0xf8] sm:$0xf0] }
  0xc9   :  { %1651 = vmatpush.bf16.msrb.mxu3 %v3085_v7  ;;  %v2877_v7 = vor.u32 %v3780_v62, %v2874_v63  ;;  %v3258_v18 = vld [vmem:[#allocation6 + $0x518] sm:$0xf0]  ;;  %v3412_v62 = vld [vmem:[#allocation9 + $0x20] sm:$0xf]  ;;  %v3916_v63 = vld [vmem:[#allocation9 + $0x24] sm:$0xf0] }
  0xca   :  { %1664 = vmatpush.bf16.msra.mxu2 %v3229_v2  ;;  %v3908_v2 = vld [vmem:[#allocation6 + $0x60c] sm:$0xf]  ;;  %v3261_v19 = vor.u32 %v3876_v17, %v3258_v18  ;;  %v4304_v36 = vpop.f32.mrf.mxu1  ;;  %v3413_v0 = vor.u32 %v3916_v63, %v3412_v62  ;;  %v3460_v17 = vld [vmem:[#allocation9 + $0x80] sm:$0xf] }
  0xcb   :  { %1678 = vmatpush.bf16.msrb.mxu0 %v3357_v14  ;;  %v3389_v14 = vor.u32 %v3908_v2, %v3386_v3  ;;  %v4292_v21 = vpop.f32.mrf.mxu2  ;;  %v3932_v2 = vld [vmem:[#allocation9 + $0xa4] sm:$0xf0] }
  0xcc   :  { %1638 = vmatpush.bf16.msrb.mxu1 %v2941_v16  ;;  %v3133_v16 = vor.u32 %v3844_v12, %v3130_v13  ;;  %v3930_v12 = vld [vmem:[#allocation9 + $0x94] sm:$0xf0] }
  0xcd   :  { %1652 = vmatpush.bf16.msrb.mxu3 %v3069_v20  ;;  %v4290_v20 = vpop.f32.mrf.mxu0 }
  0xce   :  { %1665 = vmatpush.bf16.msra.mxu2 %v3213_v15  ;;  %v3277_v15 = vor.u32 %v3880_v8, %v3274_v10  ;;  %v3914_v8 = vld [vmem:[#allocation9 + $0x14] sm:$0xf0]  ;;  %v3468_v10 = vld [vmem:[#allocation9 + $0x90] sm:$0xf] }
  0xcf   :  { %1679 = vmatpush.bf16.msrb.mxu0 %v3341_v59  ;;  %v4297_v59 = vpop.f32.mrf.mxu3  ;;  %v3469_v13 = vor.u32 %v3930_v12, %v3468_v10 }
  0xd0   :  { %1639 = vmatpush.bf16.msrb.mxu1 %v2925_v27 }
  0xd1   :  { %1653 = vmatpush.bf16.msrb.mxu3 %v3053_v31  ;;  %v3940_v31 = vld [vmem:[#allocation9 + $0xe4] sm:$0xf0] }
  0xd2   :  { %1666 = vmatpush.bf16.msra.mxu2 %v3197_v26  ;;  %v3942_v26 = vld [vmem:[#allocation9 + $0xf4] sm:$0xf0] }
  0xd3   :  { %1680 = vmatpush.bf16.msrb.mxu0 %v3325_v9  ;;  %v4300_v27 = vpop.f32.mrf.mxu2  ;;  %v3437_v9 = vor.u32 %v3922_v35, %v3436_v34  ;;  %v3923_v35 = vld [vmem:[#allocation9 + $0x64] sm:$0xf] }
  0xd4   :  { %1640 = vmatpush.bf16.msrb.mxu1 %v2909_v39  ;;  %v1709_v39 = vld [vmem:[#allocation8] sm:$0xf] }
  0xd5   :  { %1654 = vmatpush.bf16.msrb.mxu3 %v3037_v44  ;;  %v4302_v32 = vpop.f32.mrf.mxu0  ;;  %1711 = vst [vmem:[#allocation1] ss:$9 sm:$0xff] %v1709_v39  ;;  %v3920_v44 = vld [vmem:[#allocation9 + $0x44] sm:$0xf0]  ;;  %v3510_v39 = vld [vmem:[#allocation9 + $0xe8] sm:$0xf0] }
  0xd6   :  { %1667 = vmatpush.bf16.msra.mxu2 %v3181_v37  ;;  %v3938_v37 = vld [vmem:[#allocation9 + $0xd4] sm:$0xf0]  ;;  %v3429_v46 = vor.u32 %v3920_v44, %v3428_v42 }
  0xd7   :  { %1681 = vmatpush.bf16.msrb.mxu0 %v3309_v50  ;;  %v4308_v41 = vpop.f32.mrf.mxu3  ;;  %v3493_v50 = vor.u32 %v3936_v47, %v3492_v45 }
  0xd8   :  { %1641 = vmatpush.bf16.msrb.mxu1 %v2893_v54 }
  0xd9   :  { %1655 = vmatpush.bf16.msrb.mxu3 %v3021_v60 }
  0xda   :  { %1668 = vmatpush.bf16.msra.mxu2 %v3165_v53  ;;  %v3484_v53 = vld [vmem:[#allocation9 + $0xb0] sm:$0xf] }
  0xdb   :  { %1682 = vmatpush.bf16.msrb.mxu0 %v3293_v5  ;;  %v4312_v49 = vpop.f32.mrf.mxu2  ;;  %v3485_v58 = vor.u32 %v3934_v57, %v3484_v53  ;;  %v3477_v5 = vor.u32 %v3932_v2, %v3476_v1  ;;  %v3430_v1 = vld [vmem:[#allocation9 + $0x48] sm:$0xf0]  ;;  %v3935_v2 = vld [vmem:[#allocation9 + $0xc4] sm:$0xf] }
  0xdc   :  { %1642 = vmatpush.bf16.msrb.mxu1 %v2877_v7  ;;  %v4314_v54 = vpop.f32.mrf.mxu1  ;;  %v3404_v7 = vld [vmem:[#allocation9 + $0x10] sm:$0xf]  ;;  %v1712_v57 = vld [vmem:[#allocation1] sm:$0xff] }
  0xdd   :  { %1656 = vmatpush.bf16.msrb.mxu3 %v3005_v11  ;;  %v4310_v48 = vpop.f32.mrf.mxu0  ;;  %v3405_v11 = vor.u32 %v3914_v8, %v3404_v7  ;;  %v3494_v7 = vld [vmem:[#allocation9 + $0xc8] sm:$0xf0] }
  0xde   :  { %1669 = vmatpush.bf16.msra.mxu2 %v3149_v6  ;;  %v3497_v10 = vor.u32 %v3935_v2, %v3494_v7 }
  0xdf   :  { %1683 = vmatpush.bf16.msrb.mxu0 %v3277_v15  ;;  %1643 = vmatmul.bf16.vlgmr.msrb.gmra.mxu1 %v4246_v55  ;;  %v3453_v55 = vor.u32 %v3926_v24, %v3452_v23  ;;  %v3396_v15 = vld [vmem:[#allocation9] sm:$0xf]  ;;  %v3928_v24 = vld [vmem:[#allocation9 + $0x84] sm:$0xf0] }
  0xe0   :  { %1698 = vmatpush.bf16.msra.mxu1 %v3389_v14  ;;  %1657 = vmatmul.bf16.vlgmr.msrb.gmra.mxu3 %v4250_v61  ;;  %v3517_v61 = vor.u32 %v3942_v26, %v3516_v25  ;;  %v3925_v25 = vld [vmem:[#allocation9 + $0x74] sm:$0xf]  ;;  %v3461_v26 = vor.u32 %v3928_v24, %v3460_v17 }
  0xe1   :  { %2192 = vmatpush.bf16.msra.mxu3 %v3453_v55  ;;  %v3454_v55 = vld [vmem:[#allocation9 + $0x78] sm:$0xf0] }
  0xe2   :  { %1670 = vmatpush.bf16.msra.mxu2 %v3133_v16  ;;  %v3912_v16 = vld [vmem:[#allocation9 + $0x4] sm:$0xf0] }
  0xe3   :  { %1684 = vmatpush.bf16.msrb.mxu0 %v3261_v19  ;;  %v1420_v60 = vpop.f32.mrf.mxu3  ;;  %v3397_v23 = vor.u32 %v3912_v16, %v3396_v15  ;;  %v3422_v15 = vld [vmem:[#allocation9 + $0x38] sm:$0xf0]  ;;  %v3933_v16 = vld [vmem:[#allocation9 + $0xb4] sm:$0xf] }
  0xe4   :  { %2206 = vmatpush.bf16.msrb.mxu1 %v3517_v61  ;;  %v4318_v14 = vpop.f32.mrf.mxu1  ;;  %v3457_v61 = vor.u32 %v3925_v25, %v3454_v55 }
  0xe5   :  { %1671 = vmatmul.bf16.vlgmr.msra.gmra.mxu2 %v4262_v38  ;;  %v3508_v38 = vld [vmem:[#allocation9 + $0xe0] sm:$0xf]  ;;  %2193 = vmatpush.bf16.msra.mxu3 %v3445_v30  ;;  %v4316_v6 = vpop.f32.mrf.mxu0  ;;  %v3521_v30 = vor.u32 %v3941_v28, %v3518_v29  ;;  %v3915_v29 = vld [vmem:[#allocation9 + $0x24] sm:$0xf] }
  0xe6   :  { %1685 = vmatmul.bf16.vlgmr.msrb.gmra.mxu0 %v4264_v43  ;;  %v3509_v33 = vor.u32 %v3940_v31, %v3508_v38  ;;  %v3500_v43 = vld [vmem:[#allocation9 + $0xd0] sm:$0xf]  ;;  %v1337_v38 = vadd.f32 %v4295_v22, %v4290_v20  ;;  %v3921_v20 = vld [vmem:[#allocation9 + $0x54] sm:$0xf]  ;;  %v3438_v22 = vld [vmem:[#allocation9 + $0x58] sm:$0xf0] }
  0xe7   :  { %v3501_v40 = vor.u32 %v3938_v37, %v3500_v43  ;;  %v3446_v43 = vld [vmem:[#allocation9 + $0x68] sm:$0xf0]  ;;  %v3441_v47 = vor.u32 %v3921_v20, %v3438_v22 }
  0xe8   :  { %2207 = vmatpush.bf16.msrb.mxu1 %v3509_v33  ;;  %v1434_v3 = vpop.f32.mrf.mxu2  ;;  %v3449_v37 = vor.u32 %v3923_v35, %v3446_v43  ;;  %v3913_v35 = vld [vmem:[#allocation9 + $0x14] sm:$0xf] }
  0xe9   :  { %2194 = vmatpush.bf16.msra.mxu3 %v3437_v9  ;;  %v1435_v18 = vadd.f32 %v1434_v3, %v1420_v60  ;;  %v3939_v9 = vld [vmem:[#allocation9 + $0xe4] sm:$0xf]  ;;  %v1713_v60 = vld [vmem:[#allocation1 + $0x9] sm:$0xff] }
  0xea   :  { %v3513_v44 = vor.u32 %v3939_v9, %v3510_v39  ;;  %v1719_v8 = vpack.i.b16 %v1713_v60, %v1713_v60 }
  0xeb   :  { %v1422_v19 = vpop.f32.mrf.mxu3 }
  0xec   :  { %2208 = vmatpush.bf16.msrb.mxu1 %v3501_v40  ;;  %v1351_v40 = vadd.f32 %v4286_v4, %v1337_v38  ;;  %v1721_v25 = vperm.slane %v1719_v8, 0  ;;  %v3414_v38 = vld [vmem:[#allocation9 + $0x28] sm:$0xf0] }
  0xed   :  { %2195 = vmatpush.bf16.msra.mxu3 %v3429_v46  ;;  %v3937_v46 = vld [vmem:[#allocation9 + $0xd4] sm:$0xf] }
  0xef   :  { %3393 = vmatmul.msk.bf16.vlgmr.msra.gmra.mxu1 %vm1309_vm0, %v4258_v51  ;;  %v3918_v51 = vld [vmem:[#allocation9 + $0x34] sm:$0xf0] }
  0xf0   :  { %2209 = vmatpush.bf16.msrb.mxu1 %v3493_v50  ;;  %v3421_v56 = vor.u32 %v3918_v51, %v3420_v52  ;;  %v1436_v33 = vpop.f32.mrf.mxu2  ;;  %v3502_v50 = vld [vmem:[#allocation9 + $0xd8] sm:$0xf0]  ;;  %v1365_v52 = vadd.f32 %v4297_v59, %v1351_v40  ;;  %v1339_v51 = vadd.f32 %v4304_v36, %v4302_v32  ;;  %v3929_v40 = vld [vmem:[#allocation9 + $0x94] sm:$0xf] }
  0xf1   :  { %v1437_v53 = vadd.f32 %v1436_v33, %v1422_v19  ;;  %v3486_v19 = vld [vmem:[#allocation9 + $0xb8] sm:$0xf0]  ;;  %v3417_v33 = vor.u32 %v3915_v29, %v3414_v38  ;;  %v3974_v29 = vld [vmem:[#allocation9 + $0x1f4] sm:$0xf0] }
  0xf2   :  { %2196 = vmatpush.bf16.msra.mxu3 %v3421_v56  ;;  %v1379_v62 = vadd.f32 %v4310_v48, %v1365_v52  ;;  %v1353_v32 = vadd.f32 %v4292_v21, %v1339_v51  ;;  %v3917_v48 = vld [vmem:[#allocation9 + $0x34] sm:$0xf]  ;;  %v3489_v21 = vor.u32 %v3933_v16, %v3486_v19 }
  0xf4   :  { %2210 = vmatpush.bf16.msrb.mxu1 %v3485_v58  ;;  %v3505_v58 = vor.u32 %v3937_v46, %v3502_v50  ;;  %v1393_v12 = vadd.f32 %v4314_v54, %v1379_v62  ;;  %v3462_v62 = vld [vmem:[#allocation9 + $0x88] sm:$0xf0] }
  0xf6   :  { %2197 = vmatpush.bf16.msra.mxu3 %v3413_v0  ;;  %v3919_v0 = vld [vmem:[#allocation9 + $0x44] sm:$0xf] }
  0xf7   :  { %v3433_v59 = vor.u32 %v3919_v0, %v3430_v1 }
  0xf8   :  { %2211 = vmatpush.bf16.msrb.mxu1 %v3477_v5  ;;  %v1716_v5 = vpack.i.b16 %v1712_v57, %v1712_v57  ;;  %v3911_v57 = vld [vmem:[#allocation9 + $0x4] sm:$0xf] }
  0xfa   :  { %2198 = vmatpush.bf16.msra.mxu3 %v3405_v11  ;;  %v1718_v17 = vperm.slane %v1716_v5, 0 }
  0xfb   :  { %v1448_v31 = vpop.f32.mrf.mxu0 }
  0xfc   :  { %2212 = vmatpush.bf16.msrb.mxu1 %v3469_v13  ;;  %v1449_v34 = vadd.f32 %v1448_v31, %v1435_v18  ;;  %v1462_v42 = vpop.f32.mrf.mxu1  ;;  %v3425_v18 = vor.u32 %v3917_v48, %v3422_v15  ;;  %v1736_v31 = vunpack.c.l.bf16 %v1718_v17 }
  0xfe   :  { %2199 = vmatpush.bf16.msra.mxu3 %v3397_v23  ;;  %v1463_v45 = vadd.f32 %v1462_v42, %v1449_v34  ;;  %v1367_v23 = vadd.f32 %v4308_v41, %v1353_v32  ;;  %v3478_v34 = vld [vmem:[#allocation9 + $0xa8] sm:$0xf0]  ;;  %v3406_v41 = vld [vmem:[#allocation9 + $0x18] sm:$0xf0] }
  0xff   :  { %v3470_v42 = vld [vmem:[#allocation9 + $0x98] sm:$0xf0] }
 0x100   :  { %2213 = vmatpush.bf16.msrb.mxu1 %v3461_v26  ;;  %v1381_v54 = vadd.f32 %v4316_v6, %v1367_v23  ;;  %v3473_v22 = vor.u32 %v3929_v40, %v3470_v42  ;;  %v3564_v40 = vld [vmem:[#allocation9 + $0x150] sm:$0xf]  ;;  %v3954_v42 = vld [vmem:[#allocation9 + $0x154] sm:$0xf0] }
 0x102   :  { %2248 = vmatpush.bf16.msrb.mxu3 %v3457_v61  ;;  %v1407_v61 = vadd.f32 %v4300_v27, %v1393_v12  ;;  %v3409_v27 = vor.u32 %v3913_v35, %v3406_v41  ;;  %v1395_v6 = vadd.f32 %v4318_v14, %v1381_v54  ;;  %v3644_v54 = vld [vmem:[#allocation9 + $0x1f0] sm:$0xf] }
 0x103   :  { %v1476_v56 = vpop.f32.mrf.mxu3  ;;  %v1450_v4 = vpop.f32.mrf.mxu0  ;;  %v3645_v38 = vor.u32 %v3974_v29, %v3644_v54  ;;  %v3973_v29 = vld [vmem:[#allocation9 + $0x1f4] sm:$0xf] }
 0x104   :  { %2262 = vmatpush.bf16.msra.mxu1 %v3521_v30  ;;  %v1477_v63 = vadd.f32 %v1476_v56, %v1463_v45  ;;  %v1451_v36 = vadd.f32 %v1450_v4, %v1437_v53  ;;  %v1464_v11 = vpop.f32.mrf.mxu1  ;;  %v3931_v30 = vld [vmem:[#allocation9 + $0xa4] sm:$0xf]  ;;  %v1409_v51 = vadd.f32 %v4312_v49, %v1395_v6  ;;  %v3970_v6 = vld [vmem:[#allocation9 + $0x1d4] sm:$0xf0] }
 0x105   :  { %v3481_v39 = vor.u32 %v3931_v30, %v3478_v34  ;;  %v3927_v4 = vld [vmem:[#allocation9 + $0x84] sm:$0xf]  ;;  %2234 = vmatpush.bf16.msra.mxu0 %v3645_v38  ;;  %v3636_v34 = vld [vmem:[#allocation9 + $0x1e0] sm:$0xf] }
 0x106   :  { %2249 = vmatpush.bf16.msrb.mxu3 %v3449_v37  ;;  %v1465_v24 = vadd.f32 %v1464_v11, %v1451_v36  ;;  %v1737_v37 = vunpack.c.l.bf16 %v1721_v25  ;;  %v3465_v1 = vor.u32 %v3927_v4, %v3462_v62  ;;  %v3950_v4 = vld [vmem:[#allocation9 + $0x134] sm:$0xf0] }
 0x108   :  { %2263 = vmatpush.bf16.msra.mxu1 %v3513_v44  ;;  %v1490_v3 = vpop.f32.mrf.mxu2 }
 0x109   :  { %v1491_v13 = vadd.f32 %v1490_v3, %v1477_v63 }
 0x10a   :  { %2250 = vmatpush.bf16.msrb.mxu3 %v3441_v47 }
 0x10b   :  { %v1478_v55 = vpop.f32.mrf.mxu3  ;;  %v1504_v26 = vpop.f32.mrf.mxu0 }
 0x10c   :  { %2264 = vmatpush.bf16.msra.mxu1 %v3505_v58  ;;  %v1505_v28 = vadd.f32 %v1504_v26, %v1491_v13  ;;  %v1479_v43 = vadd.f32 %v1478_v55, %v1465_v24  ;;  %v3398_v58 = vld [vmem:[#allocation9 + $0x8] sm:$0xf0]  ;;  %v3580_v26 = vld [vmem:[#allocation9 + $0x170] sm:$0xf] }
 0x10d   :  { %v3401_v60 = vor.u32 %v3911_v57, %v3398_v58  ;;  %v3548_v58 = vld [vmem:[#allocation9 + $0x130] sm:$0xf] }
 0x10e   :  { %2251 = vmatpush.bf16.msrb.mxu3 %v3433_v59  ;;  %v1705_v9 = vpack.c.bf16 %v1505_v28, %v1407_v61  ;;  %v3958_v61 = vld [vmem:[#allocation9 + $0x174] sm:$0xf0]  ;;  %v3549_v62 = vor.u32 %v3950_v4, %v3548_v58  ;;  %v3951_v4 = vld [vmem:[#allocation9 + $0x144] sm:$0xf] }
 0x10f   :  { %v3581_v28 = vor.u32 %v3958_v61, %v3580_v26  ;;  %v3960_v26 = vld [vmem:[#allocation9 + $0x184] sm:$0xf0]  ;;  %v3957_v61 = vld [vmem:[#allocation9 + $0x174] sm:$0xf] }
 0x110   :  { %2265 = vmatpush.bf16.msra.mxu1 %v3497_v10  ;;  %v1492_v44 = vpop.f32.mrf.mxu2  ;;  %v1728_v45 = vunpack.c.l.bf16 %v1705_v9  ;;  %v1729_v20 = vunpack.c.h.bf16 %v1705_v9 }
 0x111   :  { %v1493_v50 = vadd.f32 %v1492_v44, %v1479_v43  ;;  %2220 = vmatpush.bf16.msrb.mxu2 %v3581_v28  ;;  %v3972_v43 = vld [vmem:[#allocation9 + $0x1e4] sm:$0xf0]  ;;  %v3628_v44 = vld [vmem:[#allocation9 + $0x1d0] sm:$0xf]  ;;  %v3582_v28 = vld [vmem:[#allocation9 + $0x178] sm:$0xf0] }
 0x112   :  { %2252 = vmatpush.bf16.msrb.mxu3 %v3425_v18  ;;  %v1740_v46 = vadd.f32 %v1736_v31, %v1728_v45  ;;  %v1741_v47 = vadd.f32 %v1737_v37, %v1729_v20  ;;  %v3629_v45 = vor.u32 %v3970_v6, %v3628_v44  ;;  %v3556_v20 = vld [vmem:[#allocation9 + $0x140] sm:$0xf]  ;;  %v3638_v6 = vld [vmem:[#allocation9 + $0x1e8] sm:$0xf0] }
 0x113   :  { %v1506_v52 = vpop.f32.mrf.mxu0 }
 0x114   :  { %2266 = vmatpush.bf16.msra.mxu1 %v3489_v21  ;;  %v1748_v53 = vpack.c.bf16 %v1741_v47, %v1740_v46  ;;  %v1507_v56 = vadd.f32 %v1506_v52, %v1493_v50  ;;  %v3620_v46 = vld [vmem:[#allocation9 + $0x1c0] sm:$0xf]  ;;  %v3968_v52 = vld [vmem:[#allocation9 + $0x1c4] sm:$0xf0] }
 0x116   :  { %2253 = vmatpush.bf16.msrb.mxu3 %v3417_v33  ;;  %v1752_v14 = vunpack.c.l.bf16 %v1748_v53  ;;  %v1753_v63 = vunpack.c.h.bf16 %v1748_v53  ;;  %v1707_v0 = vpack.c.bf16 %v1507_v56, %v1409_v51  ;;  %v3956_v33 = vld [vmem:[#allocation9 + $0x164] sm:$0xf0] }
 0x118   :  { %2267 = vmatpush.bf16.msra.mxu1 %v3481_v39  ;;  %v1732_v2 = vunpack.c.l.bf16 %v1707_v0  ;;  %v1733_v3 = vunpack.c.h.bf16 %v1707_v0  ;;  %v1768_v5 = vmul.f32 0.20019531, %v1752_v14  ;;  %v1769_v59 = vmul.f32 0.20019531, %v1753_v63  ;;  %v3540_v0 = vld [vmem:[#allocation9 + $0x120] sm:$0xf] }
 0x119   :  { %vm1760_vm1 = vcmp.gt.f32.partialorder %v1752_v14, 0.0  ;;  %vm1761_vm2 = vcmp.gt.f32.partialorder %v1753_v63, 0.0  ;;  %v3637_v39 = vor.u32 %v3972_v43, %v3636_v34  ;;  %v3966_v14 = vld [vmem:[#allocation9 + $0x1b4] sm:$0xf0] }
 0x11a   :  { %2254 = vmatpush.bf16.msrb.mxu3 %v3409_v27  ;;  %v1744_v7 = vadd.f32 %v1736_v31, %v1732_v2  ;;  %v1745_v49 = vadd.f32 %v1737_v37, %v1733_v3  ;;  %v1776_v10 = vpack.c.bf16 %v1769_v59, %v1768_v5  ;;  %vm1780_vm5 = vmpackc.low %vm1761_vm2, %vm1760_vm1  ;;  %v3572_v31 = vld [vmem:[#allocation9 + $0x160] sm:$0xf]  ;;  %v3565_v27 = vor.u32 %v3954_v42, %v3564_v40  ;;  %v3964_v59 = vld [vmem:[#allocation9 + $0x1a4] sm:$0xf0] }
 0x11b   :  { %v3573_v41 = vor.u32 %v3956_v33, %v3572_v31  ;;  %2235 = vmatpush.bf16.msra.mxu0 %v3637_v39  ;;  %v3604_v5 = vld [vmem:[#allocation9 + $0x1a0] sm:$0xf]  ;;  %v3585_v31 = vor.u32 %v3957_v61, %v3582_v28  ;;  %v3646_v33 = vld [vmem:[#allocation9 + $0x1f8] sm:$0xf0]  ;;  %v3955_v39 = vld [vmem:[#allocation9 + $0x164] sm:$0xf] }
 0x11c   :  { %2268 = vmatpush.bf16.msra.mxu1 %v3473_v22  ;;  %v1750_v32 = vpack.c.bf16 %v1745_v49, %v1744_v7  ;;  %v1784_v48 = vsel %vm1780_vm5, %v1748_v53, %v1776_v10  ;;  %v4336_v21 = vpop.f32.mrf.mxu1  ;;  %v3952_v22 = vld [vmem:[#allocation9 + $0x144] sm:$0xf0]  ;;  %v3621_v53 = vor.u32 %v3968_v52, %v3620_v46  ;;  %v3605_v7 = vor.u32 %v3964_v59, %v3604_v5  ;;  %v3596_v10 = vld [vmem:[#allocation9 + $0x190] sm:$0xf]  ;;  %v3574_v40 = vld [vmem:[#allocation9 + $0x168] sm:$0xf0] }
 0x11d   :  { %v1856_v16 = vunpack.c.l.b16 %v1784_v48  ;;  %v1857_v18 = vunpack.c.h.b16 %v1784_v48  ;;  %2221 = vmatpush.bf16.msrb.mxu2 %v3573_v41  ;;  %v3557_v50 = vor.u32 %v3952_v22, %v3556_v20  ;;  %v3649_v41 = vor.u32 %v3973_v29, %v3646_v33  ;;  %v3971_v42 = vld [vmem:[#allocation9 + $0x1e4] sm:$0xf]  ;;  %v3566_v52 = vld [vmem:[#allocation9 + $0x158] sm:$0xf0]  ;;  %v3606_v28 = vld [vmem:[#allocation9 + $0x1a8] sm:$0xf0] }
 0x11e   :  { %2255 = vmatpush.bf16.msrb.mxu3 %v3401_v60  ;;  %v1756_v36 = vunpack.c.l.bf16 %v1750_v32  ;;  %v1757_v8 = vunpack.c.h.bf16 %v1750_v32  ;;  %v3612_v60 = vld [vmem:[#allocation9 + $0x1b0] sm:$0xf] }
 0x11f   :  { %v4334_v23 = vpop.f32.mrf.mxu0  ;;  %2236 = vmatpush.bf16.msra.mxu0 %v3629_v45  ;;  %v3613_v63 = vor.u32 %v3966_v14, %v3612_v60  ;;  %v3641_v45 = vor.u32 %v3971_v42, %v3638_v6  ;;  %v3558_v60 = vld [vmem:[#allocation9 + $0x148] sm:$0xf0]  ;;  %v3945_v42 = vld [vmem:[#allocation9 + $0x114] sm:$0xf] }
 0x120   :  { %2269 = vmatpush.bf16.msra.mxu1 %v3465_v1  ;;  %v1772_v11 = vmul.f32 0.20019531, %v1756_v36  ;;  %v1773_v12 = vmul.f32 0.20019531, %v1757_v8  ;;  %vm1764_vm3 = vcmp.gt.f32.partialorder %v1756_v36, 0.0  ;;  %vm1765_vm4 = vcmp.gt.f32.partialorder %v1757_v8, 0.0  ;;  %v3948_v1 = vld [vmem:[#allocation9 + $0x124] sm:$0xf0] }
 0x121   :  { %vm1782_vm6 = vmpackc.low %vm1765_vm4, %vm1764_vm3  ;;  %2222 = vmatpush.bf16.msrb.mxu2 %v3565_v27  ;;  %v3541_v3 = vor.u32 %v3948_v1, %v3540_v0  ;;  %v3532_v36 = vld [vmem:[#allocation9 + $0x110] sm:$0xf]  ;;  %v3946_v8 = vld [vmem:[#allocation9 + $0x114] sm:$0xf0]  ;;  %v3577_v27 = vor.u32 %v3955_v39, %v3574_v40  ;;  %v3561_v59 = vor.u32 %v3951_v4, %v3558_v60 }
 0x122   :  { %v1778_v13 = vpack.c.bf16 %v1773_v12, %v1772_v11  ;;  %v3533_v11 = vor.u32 %v3946_v8, %v3532_v36  ;;  %v3962_v12 = vld [vmem:[#allocation9 + $0x194] sm:$0xf0]  ;;  %v3622_v0 = vld [vmem:[#allocation9 + $0x1c8] sm:$0xf0] }
 0x123   :  { %v4340_v30 = vpop.f32.mrf.mxu3  ;;  %2237 = vmatpush.bf16.msra.mxu0 %v3621_v53  ;;  %v3597_v48 = vor.u32 %v3962_v12, %v3596_v10  ;;  %v3969_v53 = vld [vmem:[#allocation9 + $0x1d4] sm:$0xf] }
 0x124   :  { %v1786_v15 = vsel %vm1782_vm6, %v1750_v32, %v1778_v13  ;;  %v4342_v35 = vpop.f32.mrf.mxu1  ;;  %v1533_v43 = vadd.f32 %v4340_v30, %v4336_v21  ;;  %v3630_v30 = vld [vmem:[#allocation9 + $0x1d8] sm:$0xf0] }
 0x125   :  { %v1860_v17 = vunpack.c.l.b16 %v1786_v15  ;;  %v1861_v19 = vunpack.c.h.b16 %v1786_v15  ;;  %2223 = vmatpush.bf16.msrb.mxu2 %v3557_v50  ;;  %v4360_v15 = vld [vmem:[#allocation1 + $0x12] sm:$0xff]  ;;  %v3633_v14 = vor.u32 %v3969_v53, %v3630_v30 }
 0x126   :  { %v1547_v46 = vadd.f32 %v4334_v23, %v1533_v43  ;;  %v3953_v50 = vld [vmem:[#allocation9 + $0x154] sm:$0xf]  ;;  %v1722_v10 = vpack.i.b16 %v4360_v15, %v4360_v15 }
 0x127   :  { %v1864_v24 = vpack.c.b16 %v1860_v17, %v1856_v16  ;;  %v1865_v25 = vpack.c.b16 %v1861_v19, %v1857_v18  ;;  %v4338_v55 = vpop.f32.mrf.mxu0  ;;  %2238 = vmatpush.bf16.msra.mxu0 %v3613_v63  ;;  %v4362_v16 = vld [vmem:[#allocation1 + $0x1b] sm:$0xff]  ;;  %v3944_v18 = vld [vmem:[#allocation9 + $0x104] sm:$0xf0]  ;;  %v3569_v21 = vor.u32 %v3953_v50, %v3566_v52 }
 0x128   :  { %v4344_v9 = vpop.f32.mrf.mxu2  ;;  %v3524_v17 = vld [vmem:[#allocation9 + $0x100] sm:$0xf]  ;;  %v3967_v63 = vld [vmem:[#allocation9 + $0x1c4] sm:$0xf]  ;;  %v1724_v61 = vperm.slane %v1722_v10, 0 }
 0x129   :  { %2200 = vmatmul.bf16.vlgmr.msra.gmra.mxu3 %v1864_v24  ;;  %2214 = vmatmul.bf16.vlgmr.msrb.gmra.mxu1 %v1865_v25  ;;  %v3588_v19 = vld [vmem:[#allocation9 + $0x180] sm:$0xf]  ;;  %v1561_v23 = vadd.f32 %v4344_v9, %v1547_v46 }
 0x12a   :  { %2224 = vmatpush.bf16.msrb.mxu2 %v3549_v62  ;;  %v3589_v54 = vor.u32 %v3960_v26, %v3588_v19  ;;  %v3614_v19 = vld [vmem:[#allocation9 + $0x1b8] sm:$0xf0]  ;;  %v1738_v6 = vunpack.c.l.bf16 %v1724_v61 }
 0x12b   :  { %v4348_v47 = vpop.f32.mrf.mxu3  ;;  %2239 = vmatpush.bf16.msra.mxu0 %v3605_v7 }
 0x12c   :  { %v1535_v1 = vadd.f32 %v4348_v47, %v4342_v35 }
 0x12e   :  { %2225 = vmatpush.bf16.msrb.mxu2 %v3541_v3  ;;  %v1549_v35 = vadd.f32 %v4338_v55, %v1535_v1  ;;  %v3963_v55 = vld [vmem:[#allocation9 + $0x1a4] sm:$0xf] }
 0x12f   :  { %v4346_v37 = vpop.f32.mrf.mxu0  ;;  %2240 = vmatpush.bf16.msra.mxu0 %v3597_v48  ;;  %v3550_v48 = vld [vmem:[#allocation9 + $0x138] sm:$0xf0]  ;;  %v3609_v40 = vor.u32 %v3963_v55, %v3606_v28  ;;  %v3981_v55 = vld [vmem:[#allocation11 + $0x30] sm:$0xff] }
 0x130   :  { %v4352_v56 = vpop.f32.mrf.mxu2  ;;  %v3989_v28 = vld [vmem:[#allocation11 + $0x70] sm:$0xff] }
 0x131   :  { %v1563_v29 = vadd.f32 %v4352_v56, %v1549_v35  ;;  %v3598_v56 = vld [vmem:[#allocation9 + $0x198] sm:$0xf0] }
 0x132   :  { %2226 = vmatpush.bf16.msrb.mxu2 %v3533_v11  ;;  %v1725_v11 = vpack.i.b16 %v4362_v16, %v4362_v16 }
 0x133   :  { %2241 = vmatpush.bf16.msra.mxu0 %v3589_v54 }
 0x134   :  { %v1727_v16 = vperm.slane %v1725_v11, 0 }
 0x137   :  { %v4354_v57 = vpop.f32.mrf.mxu0  ;;  %2290 = vmatpush.bf16.msrb.mxu0 %v3649_v41 }
 0x139   :  { %2256 = vmatmul.bf16.vlgmr.msrb.gmra.mxu3 %v1864_v24  ;;  %2270 = vmatmul.bf16.vlgmr.msra.gmra.mxu1 %v1865_v25  ;;  %v2306_v24 = vld [vmem:[%s4400_s4] sm:$0x3]  ;;  %v3525_v25 = vor.u32 %v3944_v18, %v3524_v17  ;;  %v3965_v17 = vld [vmem:[#allocation9 + $0x1b4] sm:$0xf] }
 0x13a   :  { %2308 = vst [vmem:[#allocation1] ss:$9 sm:$0xff] %v2306_v24  ;;  %v3947_v24 = vld [vmem:[#allocation9 + $0x124] sm:$0xf]  ;;  %v3617_v54 = vor.u32 %v3965_v17, %v3614_v19 }
 0x13b   :  { %2227 = vmatpush.bf16.msrb.mxu2 %v3525_v25  ;;  %2291 = vmatpush.bf16.msrb.mxu0 %v3641_v45  ;;  %v3542_v25 = vld [vmem:[#allocation9 + $0x128] sm:$0xf0]  ;;  %v1739_v45 = vunpack.c.l.bf16 %v1727_v16  ;;  %v3982_v16 = vld [vmem:[#allocation11 + $0x38] sm:$0xff] }
 0x13c   :  { %v4350_v51 = vpop.f32.mrf.mxu1  ;;  %v3545_v41 = vor.u32 %v3947_v24, %v3542_v25  ;;  %2485 = vmatpush.bf16.msra.mxu3 %v3982_v16 }
 0x13d   :  { %v1575_v36 = vadd.f32 %v4350_v51, %v1561_v23 }
 0x13f   :  { %2276 = vmatpush.bf16.msra.mxu2 %v3585_v31  ;;  %2292 = vmatpush.bf16.msrb.mxu0 %v3633_v14  ;;  %v3590_v14 = vld [vmem:[#allocation9 + $0x188] sm:$0xf0] }
 0x140   :  { %2486 = vmatpush.bf16.msra.mxu3 %v3981_v55 }
 0x143   :  { %v4356_v2 = vpop.f32.mrf.mxu3  ;;  %v1630_v13 = vpop.f32.mrf.mxu0  ;;  %2277 = vmatpush.bf16.msra.mxu2 %v3577_v27 }
 0x144   :  { %v4358_v49 = vpop.f32.mrf.mxu1  ;;  %v1589_v9 = vadd.f32 %v4356_v2, %v1575_v36 }
 0x145   :  { %v1577_v43 = vadd.f32 %v4358_v49, %v1563_v29 }
 0x146   :  { %v1603_v33 = vadd.f32 %v4346_v37, %v1589_v9 }
 0x147   :  { %2278 = vmatpush.bf16.msra.mxu2 %v3569_v21  ;;  %v3526_v21 = vld [vmem:[#allocation9 + $0x108] sm:$0xf0] }
 0x148   :  { %v1616_v32 = vpop.f32.mrf.mxu2 }
 0x149   :  { %v1631_v20 = vadd.f32 %v1630_v13, %v1616_v32  ;;  %v3625_v32 = vor.u32 %v3967_v63, %v3622_v0  ;;  %v3949_v13 = vld [vmem:[#allocation9 + $0x134] sm:$0xf] }
 0x14a   :  { %v3553_v51 = vor.u32 %v3949_v13, %v3550_v48 }
 0x14b   :  { %v4367_v38 = vpop.f32.mrf.mxu3  ;;  %v1632_v22 = vpop.f32.mrf.mxu0  ;;  %2279 = vmatpush.bf16.msra.mxu2 %v3561_v59  ;;  %2293 = vmatpush.bf16.msrb.mxu0 %v3625_v32 }
 0x14c   :  { %v1591_v46 = vadd.f32 %v4367_v38, %v1577_v43  ;;  %v3987_v43 = vld [vmem:[#allocation11 + $0x60] sm:$0xff] }
 0x14e   :  { %v1605_v0 = vadd.f32 %v4354_v57, %v1591_v46 }
 0x14f   :  { %2280 = vmatpush.bf16.msra.mxu2 %v3553_v51  ;;  %2294 = vmatpush.bf16.msrb.mxu0 %v3617_v54  ;;  %v3990_v54 = vld [vmem:[#allocation11 + $0x78] sm:$0xff] }
 0x150   :  { %v1618_v44 = vpop.f32.mrf.mxu2  ;;  %2499 = vmatpush.bf16.msrb.mxu1 %v3990_v54 }
 0x151   :  { %v1633_v47 = vadd.f32 %v1632_v22, %v1618_v44  ;;  %v3534_v44 = vld [vmem:[#allocation9 + $0x118] sm:$0xf0]  ;;  %v3961_v22 = vld [vmem:[#allocation9 + $0x194] sm:$0xf] }
 0x152   :  { %v3537_v52 = vor.u32 %v3945_v42, %v3534_v44  ;;  %v3601_v49 = vor.u32 %v3961_v22, %v3598_v56  ;;  %v3978_v42 = vld [vmem:[#allocation11 + $0x18] sm:$0xff]  ;;  %v3976_v22 = vld [vmem:[#allocation11 + $0x8] sm:$0xff] }
 0x153   :  { %2281 = vmatpush.bf16.msra.mxu2 %v3545_v41  ;;  %2295 = vmatpush.bf16.msrb.mxu0 %v3609_v40  ;;  %v3979_v41 = vld [vmem:[#allocation11 + $0x20] sm:$0xff]  ;;  %v3986_v44 = vld [vmem:[#allocation11 + $0x58] sm:$0xff]  ;;  %v3984_v56 = vld [vmem:[#allocation11 + $0x48] sm:$0xff] }
 0x154   :  { %2500 = vmatpush.bf16.msrb.mxu1 %v3989_v28 }
 0x157   :  { %2282 = vmatpush.bf16.msra.mxu2 %v3537_v52  ;;  %2296 = vmatpush.bf16.msrb.mxu0 %v3601_v49  ;;  %v2310_v52 = vld [vmem:[#allocation1 + $0x9] sm:$0xff]  ;;  %v3983_v49 = vld [vmem:[#allocation11 + $0x40] sm:$0xff] }
 0x15c   :  { %v1644_v34 = vpop.f32.mrf.mxu1 }
 0x15d   :  { %v1645_v58 = vadd.f32 %v1644_v34, %v1631_v20 }
 0x163   :  { %v1658_v62 = vpop.f32.mrf.mxu3  ;;  %v1686_v12 = vpop.f32.mrf.mxu0 }
 0x164   :  { %v1659_v3 = vadd.f32 %v1658_v62, %v1645_v58  ;;  %v1646_v5 = vpop.f32.mrf.mxu1  ;;  %v3943_v58 = vld [vmem:[#allocation9 + $0x104] sm:$0xf] }
 0x165   :  { %v1647_v18 = vadd.f32 %v1646_v5, %v1633_v47  ;;  %v3959_v62 = vld [vmem:[#allocation9 + $0x184] sm:$0xf]  ;;  %v3529_v38 = vor.u32 %v3943_v58, %v3526_v21 }
 0x166   :  { %v3593_v5 = vor.u32 %v3959_v62, %v3590_v14 }
 0x167   :  { %2283 = vmatpush.bf16.msra.mxu2 %v3529_v38 }
 0x168   :  { %v1672_v7 = vpop.f32.mrf.mxu2  ;;  %2297 = vmatpush.bf16.msrb.mxu0 %v3593_v5 }
 0x169   :  { %v1673_v8 = vadd.f32 %v1672_v7, %v1659_v3 }
 0x16b   :  { %v1660_v15 = vpop.f32.mrf.mxu3  ;;  %v1687_v26 = vadd.f32 %v1686_v12, %v1673_v8  ;;  %v1688_v53 = vpop.f32.mrf.mxu0 }
 0x16c   :  { %v1661_v2 = vadd.f32 %v1660_v15, %v1647_v18  ;;  %v1700_v31 = vpop.f32.mrf.mxu1 }
 0x16d   :  { %v1701_v34 = vadd.f32 %v1700_v31, %v1687_v26  ;;  %v3980_v31 = vld [vmem:[#allocation11 + $0x28] sm:$0xff] }
 0x16e   :  { %2487 = vmatpush.bf16.msra.mxu3 %v3980_v31 }
 0x16f   :  { %v1706_v27 = vpack.c.bf16 %v1701_v34, %v1603_v33  ;;  %v3988_v33 = vld [vmem:[#allocation11 + $0x68] sm:$0xff] }
 0x170   :  { %v1674_v39 = vpop.f32.mrf.mxu2  ;;  %2501 = vmatpush.bf16.msrb.mxu1 %v3988_v33 }
 0x171   :  { %v1675_v20 = vadd.f32 %v1674_v39, %v1661_v2  ;;  %v1730_v50 = vunpack.c.l.bf16 %v1706_v27  ;;  %v1731_v37 = vunpack.c.h.bf16 %v1706_v27 }
 0x172   :  { %2488 = vmatpush.bf16.msra.mxu3 %v3979_v41 }
 0x173   :  { %v1742_v30 = vadd.f32 %v1738_v6, %v1730_v50  ;;  %v1743_v4 = vadd.f32 %v1739_v45, %v1731_v37  ;;  %v1689_v60 = vadd.f32 %v1688_v53, %v1675_v20  ;;  %v2309_v50 = vld [vmem:[#allocation1] sm:$0xff] }
 0x174   :  { %v1702_v63 = vpop.f32.mrf.mxu1  ;;  %2502 = vmatpush.bf16.msrb.mxu1 %v3987_v43  ;;  %v3975_v53 = vld [vmem:[#allocation11] sm:$0xff] }
 0x175   :  { %v1749_v1 = vpack.c.bf16 %v1743_v4, %v1742_v30  ;;  %v1703_v3 = vadd.f32 %v1702_v63, %v1689_v60  ;;  %v2311_v30 = vpack.i.b16 %v2309_v50, %v2309_v50  ;;  %v2314_v4 = vpack.i.b16 %v2310_v52, %v2310_v52 }
 0x176   :  { %2489 = vmatpush.bf16.msra.mxu3 %v3978_v42 }
 0x177   :  { %v1754_v23 = vunpack.c.l.bf16 %v1749_v1  ;;  %v1755_v59 = vunpack.c.h.bf16 %v1749_v1  ;;  %v1708_v7 = vpack.c.bf16 %v1703_v3, %v1605_v0  ;;  %v2316_v3 = vperm.slane %v2314_v4, 0 }
 0x178   :  { %2503 = vmatpush.bf16.msrb.mxu1 %v3986_v44 }
 0x179   :  { %v1734_v32 = vunpack.c.l.bf16 %v1708_v7  ;;  %v1735_v36 = vunpack.c.h.bf16 %v1708_v7  ;;  %v1770_v8 = vmul.f32 0.20019531, %v1754_v23  ;;  %v1771_v10 = vmul.f32 0.20019531, %v1755_v59 }
 0x17a   :  { %vm1762_vm7 = vcmp.gt.f32.partialorder %v1754_v23, 0.0  ;;  %vm1763_vm8 = vcmp.gt.f32.partialorder %v1755_v59, 0.0 }
 0x17b   :  { %v1746_v11 = vadd.f32 %v1738_v6, %v1734_v32  ;;  %v1747_v35 = vadd.f32 %v1739_v45, %v1735_v36  ;;  %v1777_v9 = vpack.c.bf16 %v1771_v10, %v1770_v8  ;;  %vm1781_vm11 = vmpackc.low %vm1763_vm8, %vm1762_vm7  ;;  %v3977_v6 = vld [vmem:[#allocation11 + $0x10] sm:$0xff]  ;;  %v2322_v36 = vunpack.c.l.bf16 %v2316_v3 }
 0x17c   :  { %v3985_v45 = vld [vmem:[#allocation11 + $0x50] sm:$0xff]  ;;  %2490 = vmatpush.bf16.msra.mxu3 %v3977_v6 }
 0x17d   :  { %v1751_v47 = vpack.c.bf16 %v1747_v35, %v1746_v11  ;;  %v1785_v18 = vsel %vm1781_vm11, %v1749_v1, %v1777_v9  ;;  %2504 = vmatpush.bf16.msrb.mxu1 %v3985_v45  ;;  %v2313_v1 = vperm.slane %v2311_v30, 0 }
 0x17e   :  { %v1858_v19 = vunpack.c.l.b16 %v1785_v18  ;;  %v1859_v25 = vunpack.c.h.b16 %v1785_v18 }
 0x17f   :  { %v1758_v57 = vunpack.c.l.bf16 %v1751_v47  ;;  %v1759_v12 = vunpack.c.h.bf16 %v1751_v47  ;;  %v2321_v32 = vunpack.c.l.bf16 %v2313_v1 }
 0x180   :  { %2491 = vmatpush.bf16.msra.mxu3 %v3976_v22 }
 0x181   :  { %v1774_v13 = vmul.f32 0.20019531, %v1758_v57  ;;  %v1775_v48 = vmul.f32 0.20019531, %v1759_v12  ;;  %vm1766_vm9 = vcmp.gt.f32.partialorder %v1758_v57, 0.0  ;;  %vm1767_vm10 = vcmp.gt.f32.partialorder %v1759_v12, 0.0  ;;  %2505 = vmatpush.bf16.msrb.mxu1 %v3984_v56 }
 0x182   :  { %vm1783_vm12 = vmpackc.low %vm1767_vm10, %vm1766_vm9  ;;  %vm2585_vm10 = vcmask 122880  }
 0x183   :  { %v1779_v17 = vpack.c.bf16 %v1775_v48, %v1774_v13 }
 0x184   :  { %2492 = vmatpush.bf16.msra.mxu3 %v3975_v53 }
 0x185   :  { %v1787_v51 = vsel %vm1783_vm12, %v1751_v47, %v1779_v17  ;;  %2506 = vmatpush.bf16.msrb.mxu1 %v3983_v49 }
 0x186   :  { %v1862_v24 = vunpack.c.l.b16 %v1787_v51  ;;  %v1863_v15 = vunpack.c.h.b16 %v1787_v51 }
 0x188   :  { %v1866_v26 = vpack.c.b16 %v1862_v24, %v1858_v19  ;;  %v1867_v61 = vpack.c.b16 %v1863_v15, %v1859_v25 }
 0x18a   :  { %2228 = vmatmul.bf16.vlgmr.msrb.gmra.mxu2 %v1866_v26  ;;  %2242 = vmatmul.bf16.vlgmr.msra.gmra.mxu0 %v1867_v61 }
 0x19a   :  { %2284 = vmatmul.bf16.vlgmr.msra.gmra.mxu2 %v1866_v26  ;;  %2298 = vmatmul.bf16.vlgmr.msrb.gmra.mxu0 %v1867_v61 }
 0x1a6   :  { %v2215_v2 = vpop.f32.mrf.mxu1 }
 0x1ac   :  { %v2201_v29 = vpop.f32.mrf.mxu3 }
 0x1ad   :  { %v2216_v21 = vadd.f32 %v2215_v2, %v2201_v29 }
 0x1ae   :  { %v2217_v27 = vpop.f32.mrf.mxu1 }
 0x1b4   :  { %v2203_v39 = vpop.f32.mrf.mxu3 }
 0x1b5   :  { %v2218_v59 = vadd.f32 %v2217_v27, %v2203_v39 }
 0x1b6   :  { %v2271_v58 = vpop.f32.mrf.mxu1 }
 0x1bc   :  { %v2257_v37 = vpop.f32.mrf.mxu3 }
 0x1bd   :  { %v2272_v60 = vadd.f32 %v2271_v58, %v2257_v37  ;;  %v2540_v58 = vld [vmem:[#allocation2] sm:$0x1] }
 0x1be   :  { %v2273_v8 = vpop.f32.mrf.mxu1 }
 0x1c4   :  { %v2259_v23 = vpop.f32.mrf.mxu3 }
 0x1c5   :  { %v2274_v10 = vadd.f32 %v2273_v8, %v2259_v23 }
 0x207   :  { %v2243_v34 = vpop.f32.mrf.mxu0 }
 0x20d   :  { %v2229_v40 = vpop.f32.mrf.mxu2 }
 0x20e   :  { %v2230_v62 = vadd.f32 %v2229_v40, %v2216_v21  ;;  %v4176_v21 = vmov 0  }
 0x20f   :  { %v2245_v20 = vpop.f32.mrf.mxu0  ;;  %4006 = vset.pattern.permute.xlu0 %v4176_v21 }
 0x210   :  { %v2244_v38 = vadd.f32 %v2243_v34, %v2230_v62  ;;  %2543 = vperm.xlu0 %4006, %v2540_v58  }
 0x215   :  { %v2231_v46 = vpop.f32.mrf.mxu2 }
 0x216   :  { %v2232_v11 = vadd.f32 %v2231_v46, %v2218_v59 }
 0x217   :  { %v2299_v14 = vpop.f32.mrf.mxu0 }
 0x218   :  { %v2246_v17 = vadd.f32 %v2245_v20, %v2232_v11  ;;  %v2515_v20 = vld [vmem:[%s4402_s6] sm:$0x1] }
 0x219   :  { %v2517_v22 = vpack.i.b16 %v2515_v20, %v2515_v20 }
 0x21b   :  { %v2519_v46 = vperm.slane %v2517_v22, 0 }
 0x21d   :  { %v2285_v63 = vpop.f32.mrf.mxu2  ;;  %v2522_v53 = vunpack.c.l.bf16 %v2519_v46 }
 0x21e   :  { %v2286_v0 = vadd.f32 %v2285_v63, %v2272_v60 }
 0x21f   :  { %v2301_v48 = vpop.f32.mrf.mxu0 }
 0x220   :  { %v2300_v5 = vadd.f32 %v2299_v14, %v2286_v0 }
 0x222   :  { %v2304_v7 = vpack.c.bf16 %v2300_v5, %v2244_v38 }
 0x224   :  { %v2317_v35 = vunpack.c.l.bf16 %v2304_v7  ;;  %v2318_v47 = vunpack.c.h.bf16 %v2304_v7 }
 0x225   :  { %v2287_v57 = vpop.f32.mrf.mxu2 }
 0x226   :  { %v2323_v12 = vadd.f32 %v2321_v32, %v2317_v35  ;;  %v2324_v9 = vadd.f32 %v2322_v36, %v2318_v47  ;;  %v2288_v13 = vadd.f32 %v2287_v57, %v2274_v10  ;;  %v2539_v47 = vld [vmem:[%s4403_s7] sm:$0x1]  ;;  %s2592_s7 = sshll.u32 %s4177_s8, 4  ;;  %s2593_s7 = int_to_ptr.vmem [resolvable:$true] %s2592_s7 }
 0x228   :  { %v2327_v18 = vpack.c.bf16 %v2324_v9, %v2323_v12  ;;  %v2302_v51 = vadd.f32 %v2301_v48, %v2288_v13 }
 0x22a   :  { %v2329_v19 = vunpack.c.l.bf16 %v2327_v18  ;;  %v2330_v24 = vunpack.c.h.bf16 %v2327_v18  ;;  %v2305_v25 = vpack.c.bf16 %v2302_v51, %v2246_v17 }
 0x22c   :  { %v2319_v15 = vunpack.c.l.bf16 %v2305_v25  ;;  %v2320_v26 = vunpack.c.h.bf16 %v2305_v25  ;;  %v2337_v54 = vmul.f32 0.20019531, %v2329_v19  ;;  %v2338_v55 = vmul.f32 0.20019531, %v2330_v24 }
 0x22d   :  { %vm2333_vm13 = vcmp.gt.f32.partialorder %v2329_v19, 0.0  ;;  %vm2334_vm14 = vcmp.gt.f32.partialorder %v2330_v24, 0.0 }
 0x22e   :  { %v2325_v61 = vadd.f32 %v2321_v32, %v2319_v15  ;;  %v2326_v16 = vadd.f32 %v2322_v36, %v2320_v26  ;;  %v2341_v31 = vpack.c.bf16 %v2338_v55, %v2337_v54  ;;  %vm2343_vm1 = vmpackc.low %vm2334_vm14, %vm2333_vm13 }
 0x230   :  { %v2328_v28 = vpack.c.bf16 %v2326_v16, %v2325_v61  ;;  %v2345_v43 = vsel %vm2343_vm1, %v2327_v18, %v2341_v31 }
 0x231   :  { %v2381_v40 = vunpack.c.l.b16 %v2345_v43  ;;  %v2382_v44 = vunpack.c.h.b16 %v2345_v43 }
 0x232   :  { %v2331_v29 = vunpack.c.l.bf16 %v2328_v28  ;;  %v2332_v2 = vunpack.c.h.bf16 %v2328_v28 }
 0x234   :  { %vm2335_vm15 = vcmp.gt.f32.partialorder %v2331_v29, 0.0  ;;  %vm2336_vm0 = vcmp.gt.f32.partialorder %v2332_v2, 0.0  ;;  %v2339_v33 = vmul.f32 0.20019531, %v2331_v29  ;;  %v2340_v34 = vmul.f32 0.20019531, %v2332_v2 }
 0x235   :  { %vm2344_vm2 = vmpackc.low %vm2336_vm0, %vm2335_vm15 }
 0x236   :  { %v2342_v41 = vpack.c.bf16 %v2340_v34, %v2339_v33 }
 0x238   :  { %v2346_v39 = vsel %vm2344_vm2, %v2328_v28, %v2342_v41 }
 0x239   :  { %v2383_v42 = vunpack.c.l.b16 %v2346_v39  ;;  %v2384_v27 = vunpack.c.h.b16 %v2346_v39 }
 0x23b   :  { %v2385_v6 = vpack.c.b16 %v2383_v42, %v2381_v40  ;;  %v2386_v45 = vpack.c.b16 %v2384_v27, %v2382_v44 }
 0x23d   :  { %2493 = vmatmul.bf16.vlgmr.msra.gmra.mxu3 %v2385_v6  ;;  %2507 = vmatmul.bf16.vlgmr.msrb.gmra.mxu1 %v2386_v45 }
 0x282   :  { %v2544_v57 = vpop.permute.xlu0 %2543 }
 0x283   :  { %v2546_v12 = vperm.slane %v2544_v57, 0 }
 0x2ba   :  { %v2508_v56 = vpop.f32.mrf.mxu1 }
 0x2c0   :  { %v2494_v50 = vpop.f32.mrf.mxu3 }
 0x2c1   :  { %v2509_v37 = vadd.f32 %v2508_v56, %v2494_v50 }
 0x2c2   :  { %v2510_v4 = vpop.f32.mrf.mxu1 }
 0x2c3   :  { %v2513_v52 = vpack.c.bf16 %v2509_v37, %v2509_v37 }
 0x2c5   :  { %v2520_v49 = vunpack.c.l.bf16 %v2513_v52 }
 0x2c7   :  { %v2523_v30 = vadd.f32 %v2522_v53, %v2520_v49 }
 0x2c8   :  { %v2496_v60 = vpop.f32.mrf.mxu3 }
 0x2c9   :  { %v2525_v62 = vpack.c.bf16 %v2523_v30, %v2523_v30  ;;  %v2511_v14 = vadd.f32 %v2510_v4, %v2496_v60 }
 0x2cb   :  { %v2527_v63 = vunpack.c.l.bf16 %v2525_v62  ;;  %v2514_v0 = vpack.c.bf16 %v2511_v14, %v2511_v14 }
 0x2cd   :  { %v2521_v1 = vunpack.c.l.bf16 %v2514_v0  ;;  %v2531_v3 = vmul.f32 0.20019531, %v2527_v63  ;;  %vm2529_vm3 = vcmp.gt.f32.partialorder %v2527_v63, 0.0 }
 0x2ce   :  { %vm2535_vm5 = vmpackc.low %vm2529_vm3, %vm2529_vm3 }
 0x2cf   :  { %v2524_v38 = vadd.f32 %v2522_v53, %v2521_v1  ;;  %v2533_v23 = vpack.c.bf16 %v2531_v3, %v2531_v3 }
 0x2d1   :  { %v2526_v5 = vpack.c.bf16 %v2524_v38, %v2524_v38  ;;  %v2537_v32 = vsel %vm2535_vm5, %v2525_v62, %v2533_v23 }
 0x2d2   :  { %v2549_v10 = vunpack.c.l.b16 %v2537_v32 }
 0x2d3   :  { %v2528_v59 = vunpack.c.l.bf16 %v2526_v5 }
 0x2d5   :  { %vm2530_vm4 = vcmp.gt.f32.partialorder %v2528_v59, 0.0  ;;  %v2532_v7 = vmul.f32 0.20019531, %v2528_v59 }
 0x2d6   :  { %vm2536_vm6 = vmpackc.low %vm2530_vm4, %vm2530_vm4 }
 0x2d7   :  { %v2534_v36 = vpack.c.bf16 %v2532_v7, %v2532_v7 }
 0x2d9   :  { %v2538_v8 = vsel %vm2536_vm6, %v2526_v5, %v2534_v36 }
 0x2da   :  { %v2550_v11 = vunpack.c.l.b16 %v2538_v8 }
 0x2dc   :  { %v2551_v35 = vpack.c.b16 %v2550_v11, %v2549_v10 }
 0x2de   :  { %2560 = vmatpush.bf16.xpose.msrb.mxu2 %v2551_v35 }
 0x2e5   :  { %2561 = vmatmul.bf16.vlgmr.msrb.gmra.mxu2 %v2539_v47 }
 0x368   :  { %v2562_v9 = vpop.f32.mrf.mxu2 }
 0x369   :  { %v2563_v13 = vadd.f32 %v2562_v9, %v2546_v12 }
 0x36b   :  { %v3714_v48 = vmul.f32 -1.442695, %v2563_v13 }
 0x36d   :  { %4007 = vpow2.f32 %v3714_v48 }
 0x370   :  { %v2564_v17 = vpop.f32.mrf.mxu2 }
 0x373   :  { %v4008_v18 = vpop.eup %4007 }
 0x374   :  { %v2569_v51 = vadd.f32 1.0, %v4008_v18 }
 0x376   :  { %4009 = vrcp.f32 %v2569_v51  ;;  %v2581_v15 = vand.u32 2147483648, %v2569_v51  ;;  %v2579_v61 = vand.u32 2147483647, %v2569_v51  ;;  %vm2575_vm8 = vweird.f32 %v2569_v51 }
 0x378   :  { %v2582_v54 = vor.u32 1.1754944e-38, %v2581_v15  ;;  %vm2580_vm11 = vcmp.eq.f32.partialorder %v2579_v61, 8.507059e+37 }
 0x37c   :  { %v4010_v19 = vpop.eup %4009 }
 0x37d   :  { %v2571_v24 = vmul.f32 %v4010_v19, %v2569_v51  ;;  %vm2576_vm7 = vweird.f32 %v4010_v19 }
 0x37e   :  { %vm2577_vm9 = vmor %vm2575_vm8, %vm2576_vm7 }
 0x37f   :  { %v2572_v25 = vsub.f32 1.0, %v2571_v24 }
 0x381   :  { %v2573_v26 = vmul.f32 %v4010_v19, %v2572_v25 }
 0x383   :  { %v2574_v16 = vadd.f32 %v4010_v19, %v2573_v26 }
 0x385   :  { %v2578_v55 = vsel %vm2577_vm9, %v4010_v19, %v2574_v16 }
 0x386   :  { %v2583_v28 = vsel %vm2580_vm11, %v2582_v54, %v2578_v55 }
 0x387   :  { %2586 = vst.msk [vmem:[#allocation12] sm:$0x1] %vm2585_vm10, %v2583_v28 }
 0x388   :  { %2597 = dma.vmem_to_hbm [thread:$0]  %s2593_s7, 16, %s2595_s23, [#allocation5]  }
 0x389   :  { %4161 = dma.done.wait [#allocation5], 16  }
 0x38a   :  { %4162 = vsyncadd [#allocation5], 4294967280 }
 0x38b   :  { %2602 = vsyncpa [#allocation4], 1 }
 0x38c   :  { %2603 = vsyncpa [#allocation7], 1 }
 0x38d   :  { %2604 = vsyncpa [#allocation10], 1 }
 0x38e   :  { %2605 = vsyncpa [#allocation5], 1 }

</bundles_post_ra>
